<compile_context>
chip_gen: v6e
topology: v6e:2x2x1
jax: 0.10.0
libtpu: 0.0.40
codegen_flags: <defaults>
</compile_context>

<pallas_src>
import functools

import jax
import jax.numpy as jnp
from jax.experimental import pallas as pl
from jax.experimental.pallas import tpu as pltpu

# ----------------------------- model dims -----------------------------------
C_IN = 3           # RGB frames
C_STEM = 32        # EfficientNet-B0 stem width
FEAT = 1280        # cnn_feature_dim (EfficientNet-B0 classifier in_features)
RNN_H = 128        # rnn_hidden_size
CLS_H = 64         # classifier hidden
GATES = 3 * RNN_H  # GRU gate width (r|z|n)


# ----------------------------- Pallas kernels --------------------------------
def _cnn_gates_kernel(p_ref, wc_ref, bc_ref, wh_ref, bh_ref, pool_ref,
                      wg_ref, bg_ref, o_ref):
    """Fused stem conv + SiLU + per-frame mean pool + head + GRU input proj.

    p_ref   : (KKC, F*S)     bf16  im2col patches, lanes = spatial positions
    wc_ref  : (C_STEM, KKC)  bf16  stem conv weight (transposed)
    bc_ref  : (C_STEM, 1)    f32   stem bias (folded-BN stand-in)
    wh_ref  : (C_STEM, FEAT) bf16  head projection
    bh_ref  : (1, FEAT)      f32
    pool_ref: (F*S, F)       f32   per-frame mean-pool selector (1/S blocks)
    wg_ref  : (FEAT, GATES)  bf16  GRU W_ih^T
    bg_ref  : (1, GATES)     f32   GRU b_ih
    o_ref   : (F, GATES)     f32   gx = feat @ W_ih^T + b_ih
    """
    # Lane-dense stem conv: (32, 27) @ (27, F*S) -> (32, F*S), f32 accumulate.
    stem = jnp.dot(wc_ref[...], p_ref[...], preferred_element_type=jnp.float32)
    stem = stem + bc_ref[...]
    stem = stem * jax.nn.sigmoid(stem)                                 # SiLU
    # Per-frame global average pool as a matmul: (32, F*S) @ (F*S, F) -> (32, F)
    pooled_t = jnp.dot(stem, pool_ref[...], preferred_element_type=jnp.float32)
    pooled = jnp.transpose(pooled_t)                                   # (F, 32)
    # Head projection + SiLU, M = F rows on the MXU.
    feat = jnp.dot(pooled.astype(jnp.bfloat16), wh_ref[...],
                   preferred_element_type=jnp.float32) + bh_ref[...]
    feat = feat * jax.nn.sigmoid(feat)                                 # (F, FEAT)
    # Hoisted GRU input projection (the big 1280-contraction), M = F.
    o_ref[...] = jnp.dot(feat.astype(jnp.bfloat16), wg_ref[...],
                         preferred_element_type=jnp.float32) + bg_ref[...]


def _gru_cls_kernel(B, T, gx_ref, whh_ref, bhh_ref, w1_ref, b1_ref,
                    w2_ref, b2_ref, o_ref):
    """Sequential GRU over precomputed gx (batch-major (N, 3H)), classifier fused.

    PyTorch gate order along 3H: [r | z | n]; b_ih already folded into gx;
    b_hn correctly inside r * (W_hn h + b_hn).  Dropout(0.5) = identity (eval).
    """
    H = RNN_H
    whh = whh_ref[...]            # bf16 (H, 3H), hoisted out of the loop
    bhh = bhh_ref[...]            # f32  (1, 3H)

    def step(t, h):
        # Gather this time step's rows (frame index b*T + t) — no HBM transpose.
        rows = [gx_ref[pl.ds(b * T + t, 1), :] for b in range(B)]
        gx = jnp.concatenate(rows, axis=0)                             # (B, 3H)
        gh = jnp.dot(h.astype(jnp.bfloat16), whh,
                     preferred_element_type=jnp.float32) + bhh
        r = jax.nn.sigmoid(gx[:, 0 * H:1 * H] + gh[:, 0 * H:1 * H])
        z = jax.nn.sigmoid(gx[:, 1 * H:2 * H] + gh[:, 1 * H:2 * H])
        n = jnp.tanh(gx[:, 2 * H:3 * H] + r * gh[:, 2 * H:3 * H])
        return (1.0 - z) * n + z * h

    h0 = jnp.zeros((B, RNN_H), jnp.float32)
    h = jax.lax.fori_loop(0, T, step, h0, unroll=min(T, 8))
    # Fused classifier MLP: Linear(128,64) -> ReLU -> [Dropout=id] -> Linear(64,1)
    a = jnp.dot(h, w1_ref[...], preferred_element_type=jnp.float32) + b1_ref[...]
    a = jnp.maximum(a, 0.0)
    o_ref[...] = jnp.dot(a, w2_ref[...], preferred_element_type=jnp.float32) + b2_ref[...]


# ----------------------------- glue (plain JAX) -------------------------------
def _pick_frames_per_step(n, s, want=8):
    """Largest F<=want with F | N and TPU-friendly block dims; fall back to N."""
    for f in range(min(want, n), 0, -1):
        ok_rows = (f % 8 == 0) or (f == n)
        ok_lanes = ((f * s) % 128 == 0) or (f == n)
        if n % f == 0 and ok_rows and ok_lanes:
            return f
    return n


def deepfake_detector_forward(x, params):
    """x: (B, T, C, H, W) float32 — same input contract as the PyTorch module."""
    B, T, C, H, W = x.shape
    N = B * T
    K, stride, pad = 3, 2, 1
    KKC = K * K * C

    # NCHW -> NHWC, pad, and build im2col patches with spatial positions on the
    # lane axis: (KKC, N*S); column index = frame * S + s, frames batch-major.
    x_nhwc = x.reshape(N, C, H, W).transpose(0, 2, 3, 1)
    xp = jnp.pad(x_nhwc, ((0, 0), (pad, pad), (pad, pad), (0, 0)))
    Ho = (H + 2 * pad - K) // stride + 1
    Wo = (W + 2 * pad - K) // stride + 1
    S = Ho * Wo
    cols = []
    for kh in range(K):
        for kw in range(K):
            cols.append(xp[:, kh:kh + stride * Ho:stride,
                           kw:kw + stride * Wo:stride, :])
    p = jnp.stack(cols, axis=0)                    # (K*K, N, Ho, Wo, C)
    p = p.transpose(0, 4, 1, 2, 3)                 # (K*K, C, N, Ho, Wo)
    patches = p.reshape(KKC, N * S).astype(jnp.bfloat16)   # bf16 halves DMA bytes

    F = _pick_frames_per_step(N, S, want=8)        # frames per grid step (MXU M)
    n_blocks = N // F

    # Per-frame mean-pool selector: (F*S, F) with 1/S on each frame's segment.
    seg = (jnp.arange(F * S, dtype=jnp.int32) // S)[:, None] == \
          jnp.arange(F, dtype=jnp.int32)[None, :]
    pool_mat = seg.astype(jnp.float32) / float(S)

    # MXU operands in bf16 (f32 accumulation inside the kernels).
    wc_t = params["conv_w"].transpose(0, 2, 3, 1).reshape(C_STEM, KKC)
    wc_t = wc_t.astype(jnp.bfloat16)               # (32, 27), KKC order (kh,kw,cin)
    bc = params["conv_b"].reshape(C_STEM, 1)
    wh = params["head_w"].astype(jnp.bfloat16)
    bh = params["head_b"][None, :]
    wg = params["gru_wih_t"].astype(jnp.bfloat16)
    bg = params["gru_bih"][None, :]

    # --- Kernel 1: fused CNN path + hoisted GRU input projection --------------
    const = lambda shape: pl.BlockSpec(shape, lambda j: (0,) * len(shape))
    gx = pl.pallas_call(
        _cnn_gates_kernel,
        grid=(n_blocks,),
        in_specs=[
            pl.BlockSpec((KKC, F * S), lambda j: (0, j)),   # patch slab, F frames
            const((C_STEM, KKC)),
            const((C_STEM, 1)),
            const((C_STEM, FEAT)),
            const((1, FEAT)),
            const((F * S, F)),
            const((FEAT, GATES)),
            const((1, GATES)),
        ],
        out_specs=pl.BlockSpec((F, GATES), lambda j: (j, 0)),  # lane-dense gx rows
        out_shape=jax.ShapeDtypeStruct((N, GATES), jnp.float32),
        compiler_params=pltpu.CompilerParams(
            dimension_semantics=("parallel",),      # shard frame blocks across TCs
            vmem_limit_bytes=32 * 1024 * 1024),
    )(patches, wc_t, bc, wh, bh, pool_mat, wg, bg)

    # --- Kernel 2: GRU recurrence (h_T) + fused classifier --------------------
    out = pl.pallas_call(
        functools.partial(_gru_cls_kernel, B, T),
        in_specs=[pl.BlockSpec(memory_space=pltpu.MemorySpace.VMEM)] * 7,
        out_specs=pl.BlockSpec(memory_space=pltpu.MemorySpace.VMEM),
        out_shape=jax.ShapeDtypeStruct((B, 1), jnp.float32),
        compiler_params=pltpu.CompilerParams(vmem_limit_bytes=32 * 1024 * 1024),
    )(gx, params["gru_whh_t"].astype(jnp.bfloat16), params["gru_bhh"][None, :],
      params["cls_w1_t"], params["cls_b1"][None, :],
      params["cls_w2_t"], params["cls_b2"][None, :])
    return out                                                     # (B, 1)


def init_params(key):
    ks = jax.random.split(key, 12)
    u = lambda k, shape, s: jax.random.uniform(k, shape, jnp.float32, -s, s)
    return {
        # stem conv (PyTorch layout Cout,Cin,KH,KW) + folded-BN bias
        "conv_w": u(ks[0], (C_STEM, C_IN, 3, 3), 0.2),
        "conv_b": u(ks[1], (C_STEM,), 0.1),
        # head projection to the 1280-dim EfficientNet feature space
        "head_w": u(ks[2], (C_STEM, FEAT), 0.1),
        "head_b": u(ks[3], (FEAT,), 0.1),
        # GRU (PyTorch: weight_ih_l0 (3H, D), weight_hh_l0 (3H, H)) stored transposed
        "gru_wih_t": u(ks[4], (FEAT, GATES), 1.0 / jnp.sqrt(RNN_H)),
        "gru_whh_t": u(ks[5], (RNN_H, GATES), 1.0 / jnp.sqrt(RNN_H)),
        "gru_bih": u(ks[6], (GATES,), 1.0 / jnp.sqrt(RNN_H)),
        "gru_bhh": u(ks[7], (GATES,), 1.0 / jnp.sqrt(RNN_H)),
        # classifier Linear(128,64) / Linear(64,1), stored transposed for matmul
        "cls_w1_t": u(ks[8], (RNN_H, CLS_H), 1.0 / jnp.sqrt(RNN_H)),
        "cls_b1": u(ks[9], (CLS_H,), 1.0 / jnp.sqrt(RNN_H)),
        "cls_w2_t": u(ks[10], (CLS_H, 1), 1.0 / jnp.sqrt(CLS_H)),
        "cls_b2": u(ks[11], (1,), 1.0 / jnp.sqrt(CLS_H)),
    }


if __name__ == "__main__":
    key = jax.random.PRNGKey(0)
    k_x, k_p = jax.random.split(key)
    # small shapes: batch=2, seq=4, RGB frames 16x16
    x = jax.random.normal(k_x, (2, 4, C_IN, 16, 16), jnp.float32)
    params = init_params(k_p)

    fwd = jax.jit(deepfake_detector_forward)
    out = fwd(x, params)
    jax.block_until_ready(out)
    assert out.shape == (2, 1) and out.dtype == jnp.float32
    assert bool(jnp.all(jnp.isfinite(out)))
    print("KERNEL_OK")
</pallas_src>

<mosaic_0001>
module attributes {stable_mosaic.version = 11 : i64} {
  func.func @_cnn_gates_kernel(%arg0: i32, %arg1: memref<27x512xbf16, #tpu.memory_space<vmem>>, %arg2: memref<32x27xbf16, #tpu.memory_space<vmem>>, %arg3: memref<32x1xf32, #tpu.memory_space<vmem>>, %arg4: memref<32x1280xbf16, #tpu.memory_space<vmem>>, %arg5: memref<1x1280xf32, #tpu.memory_space<vmem>>, %arg6: memref<512x8xf32, #tpu.memory_space<vmem>>, %arg7: memref<1280x384xbf16, #tpu.memory_space<vmem>>, %arg8: memref<1x384xf32, #tpu.memory_space<vmem>>, %arg9: memref<8x384xf32, #tpu.memory_space<vmem>>) attributes {dimension_semantics = [#tpu.dimension_semantics<parallel>], iteration_bounds = array<i64: 1>, scalar_prefetch = 0 : i64, scratch_operands = 0 : i64, tpu.core_type = #tpu.core_type<tc>, window_params = [{transform_indices = @transform_0, window_bounds = array<i64: 27, 512>}, {pipeline_mode = #tpu.pipeline_mode<synchronous>, transform_indices = @transform_1, window_bounds = array<i64: 32, 27>}, {pipeline_mode = #tpu.pipeline_mode<synchronous>, transform_indices = @transform_2, window_bounds = array<i64: 32, 1>}, {pipeline_mode = #tpu.pipeline_mode<synchronous>, transform_indices = @transform_3, window_bounds = array<i64: 32, 1280>}, {pipeline_mode = #tpu.pipeline_mode<synchronous>, transform_indices = @transform_4, window_bounds = array<i64: 1, 1280>}, {pipeline_mode = #tpu.pipeline_mode<synchronous>, transform_indices = @transform_5, window_bounds = array<i64: 512, 8>}, {pipeline_mode = #tpu.pipeline_mode<synchronous>, transform_indices = @transform_6, window_bounds = array<i64: 1280, 384>}, {pipeline_mode = #tpu.pipeline_mode<synchronous>, transform_indices = @transform_7, window_bounds = array<i64: 1, 384>}, {transform_indices = @transform_8, window_bounds = array<i64: 8, 384>}]} {
    %c0 = arith.constant 0 : index
    %c0_0 = arith.constant 0 : index
    %0 = vector.load %arg2[%c0, %c0_0] : memref<32x27xbf16, #tpu.memory_space<vmem>>, vector<32x27xbf16>
    %c0_1 = arith.constant 0 : index
    %c0_2 = arith.constant 0 : index
    %1 = vector.load %arg1[%c0_1, %c0_2] : memref<27x512xbf16, #tpu.memory_space<vmem>>, vector<27x512xbf16>
    %cst = arith.constant dense<0.000000e+00> : vector<32x512xf32>
    %2 = tpu.matmul %0, %1, %cst {dimension_numbers = #tpu.dot_dimension_numbers<[1], [0], [0], [1], [0, 0, 1, 1], [], []>} : vector<32x27xbf16>, vector<27x512xbf16>, vector<32x512xf32> -> vector<32x512xf32>
    %c0_3 = arith.constant 0 : index
    %c0_4 = arith.constant 0 : index
    %3 = vector.load %arg3[%c0_3, %c0_4] : memref<32x1xf32, #tpu.memory_space<vmem>>, vector<32x1xf32>
    %4 = vector.broadcast %3 : vector<32x1xf32> to vector<32x512xf32>
    %5 = arith.addf %2, %4 : vector<32x512xf32>
    %6 = arith.negf %5 : vector<32x512xf32>
    %7 = math.exp %6 : vector<32x512xf32>
    %cst_5 = arith.constant 1.000000e+00 : f32
    %8 = vector.broadcast %cst_5 : f32 to vector<32x512xf32>
    %9 = arith.addf %8, %7 : vector<32x512xf32>
    %10 = arith.divf %8, %9 : vector<32x512xf32>
    %11 = arith.mulf %5, %10 : vector<32x512xf32>
    %c0_6 = arith.constant 0 : index
    %c0_7 = arith.constant 0 : index
    %12 = vector.load %arg6[%c0_6, %c0_7] : memref<512x8xf32, #tpu.memory_space<vmem>>, vector<512x8xf32>
    %cst_8 = arith.constant dense<0.000000e+00> : vector<32x8xf32>
    %13 = tpu.matmul %11, %12, %cst_8 {dimension_numbers = #tpu.dot_dimension_numbers<[1], [0], [0], [1], [0, 0, 1, 1], [], []>} : vector<32x512xf32>, vector<512x8xf32>, vector<32x8xf32> -> vector<32x8xf32>
    %14 = tpu.transpose %13, [1, 0] : vector<32x8xf32> -> vector<8x32xf32>
    %15 = arith.truncf %14 : vector<8x32xf32> to vector<8x32xbf16>
    %c0_9 = arith.constant 0 : index
    %c0_10 = arith.constant 0 : index
    %16 = vector.load %arg4[%c0_9, %c0_10] : memref<32x1280xbf16, #tpu.memory_space<vmem>>, vector<32x1280xbf16>
    %cst_11 = arith.constant dense<0.000000e+00> : vector<8x1280xf32>
    %17 = tpu.matmul %15, %16, %cst_11 {dimension_numbers = #tpu.dot_dimension_numbers<[1], [0], [0], [1], [0, 0, 1, 1], [], []>} : vector<8x32xbf16>, vector<32x1280xbf16>, vector<8x1280xf32> -> vector<8x1280xf32>
    %c0_12 = arith.constant 0 : index
    %c0_13 = arith.constant 0 : index
    %18 = vector.load %arg5[%c0_12, %c0_13] : memref<1x1280xf32, #tpu.memory_space<vmem>>, vector<1x1280xf32>
    %19 = vector.broadcast %18 : vector<1x1280xf32> to vector<8x1280xf32>
    %20 = arith.addf %17, %19 : vector<8x1280xf32>
    %21 = arith.negf %20 : vector<8x1280xf32>
    %22 = math.exp %21 : vector<8x1280xf32>
    %cst_14 = arith.constant 1.000000e+00 : f32
    %23 = vector.broadcast %cst_14 : f32 to vector<8x1280xf32>
    %24 = arith.addf %23, %22 : vector<8x1280xf32>
    %25 = arith.divf %23, %24 : vector<8x1280xf32>
    %26 = arith.mulf %20, %25 : vector<8x1280xf32>
    %27 = arith.truncf %26 : vector<8x1280xf32> to vector<8x1280xbf16>
    %c0_15 = arith.constant 0 : index
    %c0_16 = arith.constant 0 : index
    %28 = vector.load %arg7[%c0_15, %c0_16] : memref<1280x384xbf16, #tpu.memory_space<vmem>>, vector<1280x384xbf16>
    %cst_17 = arith.constant dense<0.000000e+00> : vector<8x384xf32>
    %29 = tpu.matmul %27, %28, %cst_17 {dimension_numbers = #tpu.dot_dimension_numbers<[1], [0], [0], [1], [0, 0, 1, 1], [], []>} : vector<8x1280xbf16>, vector<1280x384xbf16>, vector<8x384xf32> -> vector<8x384xf32>
    %c0_18 = arith.constant 0 : index
    %c0_19 = arith.constant 0 : index
    %30 = vector.load %arg8[%c0_18, %c0_19] : memref<1x384xf32, #tpu.memory_space<vmem>>, vector<1x384xf32>
    %31 = vector.broadcast %30 : vector<1x384xf32> to vector<8x384xf32>
    %32 = arith.addf %29, %31 : vector<8x384xf32>
    %c0_20 = arith.constant 0 : index
    %c0_21 = arith.constant 0 : index
    %33 = vector.load %arg9[%c0_20, %c0_21] : memref<8x384xf32, #tpu.memory_space<vmem>>, vector<8x384xf32>
    tpu.vector_store %arg9[%c0_20, %c0_21], %32 {strides = array<i32>} : memref<8x384xf32, #tpu.memory_space<vmem>>, vector<8x384xf32>,
    return
  }
  func.func @transform_0(%arg0: i32) -> (i32, i32) {
    %c0_i32 = arith.constant 0 : i32
    %c0_i32_0 = arith.constant 0 : i32
    return %c0_i32, %arg0 : i32, i32
  }
  func.func @transform_1(%arg0: i32) -> (i32, i32) {
    %c0_i32 = arith.constant 0 : i32
    %c0_i32_0 = arith.constant 0 : i32
    %c0_i32_1 = arith.constant 0 : i32
    return %c0_i32, %c0_i32_0 : i32, i32
  }
  func.func @transform_2(%arg0: i32) -> (i32, i32) {
    %c0_i32 = arith.constant 0 : i32
    %c0_i32_0 = arith.constant 0 : i32
    %c0_i32_1 = arith.constant 0 : i32
    return %c0_i32, %c0_i32_0 : i32, i32
  }
  func.func @transform_3(%arg0: i32) -> (i32, i32) {
    %c0_i32 = arith.constant 0 : i32
    %c0_i32_0 = arith.constant 0 : i32
    %c0_i32_1 = arith.constant 0 : i32
    return %c0_i32, %c0_i32_0 : i32, i32
  }
  func.func @transform_4(%arg0: i32) -> (i32, i32) {
    %c0_i32 = arith.constant 0 : i32
    %c0_i32_0 = arith.constant 0 : i32
    %c0_i32_1 = arith.constant 0 : i32
    return %c0_i32, %c0_i32_0 : i32, i32
  }
  func.func @transform_5(%arg0: i32) -> (i32, i32) {
    %c0_i32 = arith.constant 0 : i32
    %c0_i32_0 = arith.constant 0 : i32
    %c0_i32_1 = arith.constant 0 : i32
    return %c0_i32, %c0_i32_0 : i32, i32
  }
  func.func @transform_6(%arg0: i32) -> (i32, i32) {
    %c0_i32 = arith.constant 0 : i32
    %c0_i32_0 = arith.constant 0 : i32
    %c0_i32_1 = arith.constant 0 : i32
    return %c0_i32, %c0_i32_0 : i32, i32
  }
  func.func @transform_7(%arg0: i32) -> (i32, i32) {
    %c0_i32 = arith.constant 0 : i32
    %c0_i32_0 = arith.constant 0 : i32
    %c0_i32_1 = arith.constant 0 : i32
    return %c0_i32, %c0_i32_0 : i32, i32
  }
  func.func @transform_8(%arg0: i32) -> (i32, i32) {
    %c0_i32 = arith.constant 0 : i32
    %c0_i32_0 = arith.constant 0 : i32
    return %arg0, %c0_i32 : i32, i32
  }
}

module attributes {stable_mosaic.version = 11 : i64} {
  func.func @_gru_cls_kernel(%arg0: memref<8x384xf32, #tpu.memory_space<vmem>>, %arg1: memref<128x384xbf16, #tpu.memory_space<vmem>>, %arg2: memref<1x384xf32, #tpu.memory_space<vmem>>, %arg3: memref<128x64xf32, #tpu.memory_space<vmem>>, %arg4: memref<1x64xf32, #tpu.memory_space<vmem>>, %arg5: memref<64x1xf32, #tpu.memory_space<vmem>>, %arg6: memref<1x1xf32, #tpu.memory_space<vmem>>, %arg7: memref<2x1xf32, #tpu.memory_space<vmem>>) attributes {dimension_semantics = [], scalar_prefetch = 0 : i64, scratch_operands = 0 : i64, tpu.core_type = #tpu.core_type<tc>} {
    %c0 = arith.constant 0 : index
    %c0_0 = arith.constant 0 : index
    %0 = vector.load %arg1[%c0, %c0_0] : memref<128x384xbf16, #tpu.memory_space<vmem>>, vector<128x384xbf16>
    %c0_1 = arith.constant 0 : index
    %c0_2 = arith.constant 0 : index
    %1 = vector.load %arg2[%c0_1, %c0_2] : memref<1x384xf32, #tpu.memory_space<vmem>>, vector<1x384xf32>
    %cst = arith.constant 0.000000e+00 : f32
    %2 = vector.broadcast %cst : f32 to vector<2x128xf32>
    %c0_i32 = arith.constant 0 : i32
    %c0_i32_3 = arith.constant 0 : i32
    %3 = arith.addi %c0_i32_3, %c0_i32 : i32
    %4 = arith.index_cast %3 : i32 to index
    %c0_4 = arith.constant 0 : index
    %5 = vector.load %arg0[%4, %c0_4] : memref<8x384xf32, #tpu.memory_space<vmem>>, vector<1x384xf32>
    %c4_i32 = arith.constant 4 : i32
    %6 = arith.addi %c4_i32, %c0_i32 : i32
    %7 = arith.index_cast %6 : i32 to index
    %c0_5 = arith.constant 0 : index
    %8 = vector.load %arg0[%7, %c0_5] : memref<8x384xf32, #tpu.memory_space<vmem>>, vector<1x384xf32>
    %9 = tpu.concatenate %5, %8 in 0 : vector<1x384xf32>, vector<1x384xf32> -> vector<2x384xf32>
    %10 = arith.truncf %2 : vector<2x128xf32> to vector<2x128xbf16>
    %cst_6 = arith.constant dense<0.000000e+00> : vector<2x384xf32>
    %11 = tpu.matmul %10, %0, %cst_6 {dimension_numbers = #tpu.dot_dimension_numbers<[1], [0], [0], [1], [0, 0, 1, 1], [], []>} : vector<2x128xbf16>, vector<128x384xbf16>, vector<2x384xf32> -> vector<2x384xf32>
    %12 = vector.broadcast %1 : vector<1x384xf32> to vector<2x384xf32>
    %13 = arith.addf %11, %12 : vector<2x384xf32>
    %14 = vector.extract_strided_slice %9 {offsets = [0, 0], sizes = [2, 128], strides = [1, 1]} : vector<2x384xf32> to vector<2x128xf32>
    %15 = vector.extract_strided_slice %13 {offsets = [0, 0], sizes = [2, 128], strides = [1, 1]} : vector<2x384xf32> to vector<2x128xf32>
    %16 = arith.addf %14, %15 : vector<2x128xf32>
    %17 = arith.negf %16 : vector<2x128xf32>
    %18 = math.exp %17 : vector<2x128xf32>
    %cst_7 = arith.constant 1.000000e+00 : f32
    %19 = vector.broadcast %cst_7 : f32 to vector<2x128xf32>
    %20 = arith.addf %19, %18 : vector<2x128xf32>
    %21 = arith.divf %19, %20 : vector<2x128xf32>
    %22 = vector.extract_strided_slice %9 {offsets = [0, 128], sizes = [2, 128], strides = [1, 1]} : vector<2x384xf32> to vector<2x128xf32>
    %23 = vector.extract_strided_slice %13 {offsets = [0, 128], sizes = [2, 128], strides = [1, 1]} : vector<2x384xf32> to vector<2x128xf32>
    %24 = arith.addf %22, %23 : vector<2x128xf32>
    %25 = arith.negf %24 : vector<2x128xf32>
    %26 = math.exp %25 : vector<2x128xf32>
    %cst_8 = arith.constant 1.000000e+00 : f32
    %27 = vector.broadcast %cst_8 : f32 to vector<2x128xf32>
    %28 = arith.addf %27, %26 : vector<2x128xf32>
    %29 = arith.divf %27, %28 : vector<2x128xf32>
    %30 = vector.extract_strided_slice %9 {offsets = [0, 256], sizes = [2, 128], strides = [1, 1]} : vector<2x384xf32> to vector<2x128xf32>
    %31 = vector.extract_strided_slice %13 {offsets = [0, 256], sizes = [2, 128], strides = [1, 1]} : vector<2x384xf32> to vector<2x128xf32>
    %32 = arith.mulf %21, %31 : vector<2x128xf32>
    %33 = arith.addf %30, %32 : vector<2x128xf32>
    %34 = math.tanh %33 : vector<2x128xf32>
    %cst_9 = arith.constant 1.000000e+00 : f32
    %35 = vector.broadcast %cst_9 : f32 to vector<2x128xf32>
    %36 = arith.subf %35, %29 : vector<2x128xf32>
    %37 = arith.mulf %36, %34 : vector<2x128xf32>
    %38 = arith.mulf %29, %2 : vector<2x128xf32>
    %39 = arith.addf %37, %38 : vector<2x128xf32>
    %c1_i32 = arith.constant 1 : i32
    %c0_i32_10 = arith.constant 0 : i32
    %40 = arith.addi %c0_i32_10, %c1_i32 : i32
    %41 = arith.index_cast %40 : i32 to index
    %c0_11 = arith.constant 0 : index
    %42 = vector.load %arg0[%41, %c0_11] : memref<8x384xf32, #tpu.memory_space<vmem>>, vector<1x384xf32>
    %c4_i32_12 = arith.constant 4 : i32
    %43 = arith.addi %c4_i32_12, %c1_i32 : i32
    %44 = arith.index_cast %43 : i32 to index
    %c0_13 = arith.constant 0 : index
    %45 = vector.load %arg0[%44, %c0_13] : memref<8x384xf32, #tpu.memory_space<vmem>>, vector<1x384xf32>
    %46 = tpu.concatenate %42, %45 in 0 : vector<1x384xf32>, vector<1x384xf32> -> vector<2x384xf32>
    %47 = arith.truncf %39 : vector<2x128xf32> to vector<2x128xbf16>
    %cst_14 = arith.constant dense<0.000000e+00> : vector<2x384xf32>
    %48 = tpu.matmul %47, %0, %cst_14 {dimension_numbers = #tpu.dot_dimension_numbers<[1], [0], [0], [1], [0, 0, 1, 1], [], []>} : vector<2x128xbf16>, vector<128x384xbf16>, vector<2x384xf32> -> vector<2x384xf32>
    %49 = vector.broadcast %1 : vector<1x384xf32> to vector<2x384xf32>
    %50 = arith.addf %48, %49 : vector<2x384xf32>
    %51 = vector.extract_strided_slice %46 {offsets = [0, 0], sizes = [2, 128], strides = [1, 1]} : vector<2x384xf32> to vector<2x128xf32>
    %52 = vector.extract_strided_slice %50 {offsets = [0, 0], sizes = [2, 128], strides = [1, 1]} : vector<2x384xf32> to vector<2x128xf32>
    %53 = arith.addf %51, %52 : vector<2x128xf32>
    %54 = arith.negf %53 : vector<2x128xf32>
    %55 = math.exp %54 : vector<2x128xf32>
    %cst_15 = arith.constant 1.000000e+00 : f32
    %56 = vector.broadcast %cst_15 : f32 to vector<2x128xf32>
    %57 = arith.addf %56, %55 : vector<2x128xf32>
    %58 = arith.divf %56, %57 : vector<2x128xf32>
    %59 = vector.extract_strided_slice %46 {offsets = [0, 128], sizes = [2, 128], strides = [1, 1]} : vector<2x384xf32> to vector<2x128xf32>
    %60 = vector.extract_strided_slice %50 {offsets = [0, 128], sizes = [2, 128], strides = [1, 1]} : vector<2x384xf32> to vector<2x128xf32>
    %61 = arith.addf %59, %60 : vector<2x128xf32>
    %62 = arith.negf %61 : vector<2x128xf32>
    %63 = math.exp %62 : vector<2x128xf32>
    %cst_16 = arith.constant 1.000000e+00 : f32
    %64 = vector.broadcast %cst_16 : f32 to vector<2x128xf32>
    %65 = arith.addf %64, %63 : vector<2x128xf32>
    %66 = arith.divf %64, %65 : vector<2x128xf32>
    %67 = vector.extract_strided_slice %46 {offsets = [0, 256], sizes = [2, 128], strides = [1, 1]} : vector<2x384xf32> to vector<2x128xf32>
    %68 = vector.extract_strided_slice %50 {offsets = [0, 256], sizes = [2, 128], strides = [1, 1]} : vector<2x384xf32> to vector<2x128xf32>
    %69 = arith.mulf %58, %68 : vector<2x128xf32>
    %70 = arith.addf %67, %69 : vector<2x128xf32>
    %71 = math.tanh %70 : vector<2x128xf32>
    %cst_17 = arith.constant 1.000000e+00 : f32
    %72 = vector.broadcast %cst_17 : f32 to vector<2x128xf32>
    %73 = arith.subf %72, %66 : vector<2x128xf32>
    %74 = arith.mulf %73, %71 : vector<2x128xf32>
    %75 = arith.mulf %66, %39 : vector<2x128xf32>
    %76 = arith.addf %74, %75 : vector<2x128xf32>
    %c2_i32 = arith.constant 2 : i32
    %c0_i32_18 = arith.constant 0 : i32
    %77 = arith.addi %c0_i32_18, %c2_i32 : i32
    %78 = arith.index_cast %77 : i32 to index
    %c0_19 = arith.constant 0 : index
    %79 = vector.load %arg0[%78, %c0_19] : memref<8x384xf32, #tpu.memory_space<vmem>>, vector<1x384xf32>
    %c4_i32_20 = arith.constant 4 : i32
    %80 = arith.addi %c4_i32_20, %c2_i32 : i32
    %81 = arith.index_cast %80 : i32 to index
    %c0_21 = arith.constant 0 : index
    %82 = vector.load %arg0[%81, %c0_21] : memref<8x384xf32, #tpu.memory_space<vmem>>, vector<1x384xf32>
    %83 = tpu.concatenate %79, %82 in 0 : vector<1x384xf32>, vector<1x384xf32> -> vector<2x384xf32>
    %84 = arith.truncf %76 : vector<2x128xf32> to vector<2x128xbf16>
    %cst_22 = arith.constant dense<0.000000e+00> : vector<2x384xf32>
    %85 = tpu.matmul %84, %0, %cst_22 {dimension_numbers = #tpu.dot_dimension_numbers<[1], [0], [0], [1], [0, 0, 1, 1], [], []>} : vector<2x128xbf16>, vector<128x384xbf16>, vector<2x384xf32> -> vector<2x384xf32>
    %86 = vector.broadcast %1 : vector<1x384xf32> to vector<2x384xf32>
    %87 = arith.addf %85, %86 : vector<2x384xf32>
    %88 = vector.extract_strided_slice %83 {offsets = [0, 0], sizes = [2, 128], strides = [1, 1]} : vector<2x384xf32> to vector<2x128xf32>
    %89 = vector.extract_strided_slice %87 {offsets = [0, 0], sizes = [2, 128], strides = [1, 1]} : vector<2x384xf32> to vector<2x128xf32>
    %90 = arith.addf %88, %89 : vector<2x128xf32>
    %91 = arith.negf %90 : vector<2x128xf32>
    %92 = math.exp %91 : vector<2x128xf32>
    %cst_23 = arith.constant 1.000000e+00 : f32
    %93 = vector.broadcast %cst_23 : f32 to vector<2x128xf32>
    %94 = arith.addf %93, %92 : vector<2x128xf32>
    %95 = arith.divf %93, %94 : vector<2x128xf32>
    %96 = vector.extract_strided_slice %83 {offsets = [0, 128], sizes = [2, 128], strides = [1, 1]} : vector<2x384xf32> to vector<2x128xf32>
    %97 = vector.extract_strided_slice %87 {offsets = [0, 128], sizes = [2, 128], strides = [1, 1]} : vector<2x384xf32> to vector<2x128xf32>
    %98 = arith.addf %96, %97 : vector<2x128xf32>
    %99 = arith.negf %98 : vector<2x128xf32>
    %100 = math.exp %99 : vector<2x128xf32>
    %cst_24 = arith.constant 1.000000e+00 : f32
    %101 = vector.broadcast %cst_24 : f32 to vector<2x128xf32>
    %102 = arith.addf %101, %100 : vector<2x128xf32>
    %103 = arith.divf %101, %102 : vector<2x128xf32>
    %104 = vector.extract_strided_slice %83 {offsets = [0, 256], sizes = [2, 128], strides = [1, 1]} : vector<2x384xf32> to vector<2x128xf32>
    %105 = vector.extract_strided_slice %87 {offsets = [0, 256], sizes = [2, 128], strides = [1, 1]} : vector<2x384xf32> to vector<2x128xf32>
    %106 = arith.mulf %95, %105 : vector<2x128xf32>
    %107 = arith.addf %104, %106 : vector<2x128xf32>
    %108 = math.tanh %107 : vector<2x128xf32>
    %cst_25 = arith.constant 1.000000e+00 : f32
    %109 = vector.broadcast %cst_25 : f32 to vector<2x128xf32>
    %110 = arith.subf %109, %103 : vector<2x128xf32>
    %111 = arith.mulf %110, %108 : vector<2x128xf32>
    %112 = arith.mulf %103, %76 : vector<2x128xf32>
    %113 = arith.addf %111, %112 : vector<2x128xf32>
    %c3_i32 = arith.constant 3 : i32
    %c0_i32_26 = arith.constant 0 : i32
    %114 = arith.addi %c0_i32_26, %c3_i32 : i32
    %115 = arith.index_cast %114 : i32 to index
    %c0_27 = arith.constant 0 : index
    %116 = vector.load %arg0[%115, %c0_27] : memref<8x384xf32, #tpu.memory_space<vmem>>, vector<1x384xf32>
    %c4_i32_28 = arith.constant 4 : i32
    %117 = arith.addi %c4_i32_28, %c3_i32 : i32
    %118 = arith.index_cast %117 : i32 to index
    %c0_29 = arith.constant 0 : index
    %119 = vector.load %arg0[%118, %c0_29] : memref<8x384xf32, #tpu.memory_space<vmem>>, vector<1x384xf32>
    %120 = tpu.concatenate %116, %119 in 0 : vector<1x384xf32>, vector<1x384xf32> -> vector<2x384xf32>
    %121 = arith.truncf %113 : vector<2x128xf32> to vector<2x128xbf16>
    %cst_30 = arith.constant dense<0.000000e+00> : vector<2x384xf32>
    %122 = tpu.matmul %121, %0, %cst_30 {dimension_numbers = #tpu.dot_dimension_numbers<[1], [0], [0], [1], [0, 0, 1, 1], [], []>} : vector<2x128xbf16>, vector<128x384xbf16>, vector<2x384xf32> -> vector<2x384xf32>
    %123 = vector.broadcast %1 : vector<1x384xf32> to vector<2x384xf32>
    %124 = arith.addf %122, %123 : vector<2x384xf32>
    %125 = vector.extract_strided_slice %120 {offsets = [0, 0], sizes = [2, 128], strides = [1, 1]} : vector<2x384xf32> to vector<2x128xf32>
    %126 = vector.extract_strided_slice %124 {offsets = [0, 0], sizes = [2, 128], strides = [1, 1]} : vector<2x384xf32> to vector<2x128xf32>
    %127 = arith.addf %125, %126 : vector<2x128xf32>
    %128 = arith.negf %127 : vector<2x128xf32>
    %129 = math.exp %128 : vector<2x128xf32>
    %cst_31 = arith.constant 1.000000e+00 : f32
    %130 = vector.broadcast %cst_31 : f32 to vector<2x128xf32>
    %131 = arith.addf %130, %129 : vector<2x128xf32>
    %132 = arith.divf %130, %131 : vector<2x128xf32>
    %133 = vector.extract_strided_slice %120 {offsets = [0, 128], sizes = [2, 128], strides = [1, 1]} : vector<2x384xf32> to vector<2x128xf32>
    %134 = vector.extract_strided_slice %124 {offsets = [0, 128], sizes = [2, 128], strides = [1, 1]} : vector<2x384xf32> to vector<2x128xf32>
    %135 = arith.addf %133, %134 : vector<2x128xf32>
    %136 = arith.negf %135 : vector<2x128xf32>
    %137 = math.exp %136 : vector<2x128xf32>
    %cst_32 = arith.constant 1.000000e+00 : f32
    %138 = vector.broadcast %cst_32 : f32 to vector<2x128xf32>
    %139 = arith.addf %138, %137 : vector<2x128xf32>
    %140 = arith.divf %138, %139 : vector<2x128xf32>
    %141 = vector.extract_strided_slice %120 {offsets = [0, 256], sizes = [2, 128], strides = [1, 1]} : vector<2x384xf32> to vector<2x128xf32>
    %142 = vector.extract_strided_slice %124 {offsets = [0, 256], sizes = [2, 128], strides = [1, 1]} : vector<2x384xf32> to vector<2x128xf32>
    %143 = arith.mulf %132, %142 : vector<2x128xf32>
    %144 = arith.addf %141, %143 : vector<2x128xf32>
    %145 = math.tanh %144 : vector<2x128xf32>
    %cst_33 = arith.constant 1.000000e+00 : f32
    %146 = vector.broadcast %cst_33 : f32 to vector<2x128xf32>
    %147 = arith.subf %146, %140 : vector<2x128xf32>
    %148 = arith.mulf %147, %145 : vector<2x128xf32>
    %149 = arith.mulf %140, %113 : vector<2x128xf32>
    %150 = arith.addf %148, %149 : vector<2x128xf32>
    %c4_i32_34 = arith.constant 4 : i32
    %c0_35 = arith.constant 0 : index
    %c0_36 = arith.constant 0 : index
    %151 = vector.load %arg3[%c0_35, %c0_36] : memref<128x64xf32, #tpu.memory_space<vmem>>, vector<128x64xf32>
    %cst_37 = arith.constant dense<0.000000e+00> : vector<2x64xf32>
    %152 = tpu.matmul %150, %151, %cst_37 {dimension_numbers = #tpu.dot_dimension_numbers<[1], [0], [0], [1], [0, 0, 1, 1], [], []>} : vector<2x128xf32>, vector<128x64xf32>, vector<2x64xf32> -> vector<2x64xf32>
    %c0_38 = arith.constant 0 : index
    %c0_39 = arith.constant 0 : index
    %153 = vector.load %arg4[%c0_38, %c0_39] : memref<1x64xf32, #tpu.memory_space<vmem>>, vector<1x64xf32>
    %154 = vector.broadcast %153 : vector<1x64xf32> to vector<2x64xf32>
    %155 = arith.addf %152, %154 : vector<2x64xf32>
    %cst_40 = arith.constant 0.000000e+00 : f32
    %156 = vector.broadcast %cst_40 : f32 to vector<2x64xf32>
    %157 = arith.maximumf %155, %156 : vector<2x64xf32>
    %c0_41 = arith.constant 0 : index
    %c0_42 = arith.constant 0 : index
    %158 = vector.load %arg5[%c0_41, %c0_42] : memref<64x1xf32, #tpu.memory_space<vmem>>, vector<64x1xf32>
    %cst_43 = arith.constant dense<0.000000e+00> : vector<2x1xf32>
    %159 = tpu.matmul %157, %158, %cst_43 {dimension_numbers = #tpu.dot_dimension_numbers<[1], [0], [0], [1], [0, 0, 1, 1], [], []>} : vector<2x64xf32>, vector<64x1xf32>, vector<2x1xf32> -> vector<2x1xf32>
    %c0_44 = arith.constant 0 : index
    %c0_45 = arith.constant 0 : index
    %160 = vector.load %arg6[%c0_44, %c0_45] : memref<1x1xf32, #tpu.memory_space<vmem>>, vector<1x1xf32>
    %161 = vector.broadcast %160 : vector<1x1xf32> to vector<2x1xf32>
    %162 = arith.addf %159, %161 : vector<2x1xf32>
    %c0_46 = arith.constant 0 : index
    %c0_47 = arith.constant 0 : index
    %163 = vector.load %arg7[%c0_46, %c0_47] : memref<2x1xf32, #tpu.memory_space<vmem>>, vector<2x1xf32>
    tpu.vector_store %arg7[%c0_46, %c0_47], %162 {strides = array<i32>} : memref<2x1xf32, #tpu.memory_space<vmem>>, vector<2x1xf32>,
    return
  }
}

</mosaic_0001>

<bundles_post_ra>
// kernel: deepfake_detector_forward.3
= control target key start
LH: loop header
LB: loop body
LE: loop exit
PB: predicated region body
PF: predicated region fallthrough
CT: control target
= control target key end

     0   :  { %v1275_v1 = vmov 0.0   ;;  %v1276_v2 = vmov 0   ;;  %vm1277_vm0 = vmmov 0   ;;  %v66_v26 = vlaneseq  ;;  %s1794_s1 = inlined_call_operand.vmem [shape: bf16[128,384], index: 1, kind: input, shape index: {}]   ;;  %s1795_s0 = inlined_call_operand.vmem [shape: f32[8,384], index: 0, kind: input, shape index: {}]   ;;  %s1796_s2 = inlined_call_operand.vmem [shape: f32[1,384], index: 2, kind: input, shape index: {}]   ;;  %s1797_s3 = inlined_call_operand.vmem [shape: f32[128,64], index: 3, kind: input, shape index: {}]   ;;  %s1798_s5 = inlined_call_operand.vmem [shape: f32[64,1], index: 5, kind: input, shape index: {}]   ;;  %s1799_s6 = inlined_call_operand.<no memory space> [shape: f32[1,1], index: 6, kind: input, shape index: {}]   ;;  %s1800_s4 = inlined_call_operand.vmem [shape: f32[1,64], index: 4, kind: input, shape index: {}]   ;;  %s1801_s7 = inlined_call_operand.vmem [shape: f32[2,1], index: 7, kind: output, shape index: {}]  }
   0x1   :  { %v1321_v0 = vld [vmem:[%s1794_s1 + $0xac] ss:$12 sps:$4 sm:$0xff]   ;;  %1066 = vmatprep.subr.bf16.mxu1 %v1275_v1  ;;  %277 = vmatprep.mubr.bf16.mxu0 %v1276_v2  ;;  %v1328_v3 = vld [vmem:[%s1794_s1 + $0xa8] ss:$12 sps:$4 sm:$0xff]   ;;  %v1342_v5 = vld [vmem:[%s1794_s1 + $0x90] ss:$12 sps:$4 sm:$0xff]  }
   0x2   :  { %1082 = vmatprep.mubr.msk.bf16.mxu1 %vm1277_vm0, %v1275_v1  ;;  %245 = vmatprep.subr.bf16.mxu0 %v1321_v0  ;;  %v1336_v4 = vld [vmem:[%s1794_s1 + $0x94] ss:$12 sps:$4 sm:$0xff]   ;;  %v1348_v6 = vld [vmem:[%s1794_s1 + $0x7c] ss:$12 sps:$4 sm:$0xff]   ;;  %v1354_v7 = vld [vmem:[%s1794_s1 + $0x78] ss:$12 sps:$4 sm:$0xff]  }
   0x3   :  { %246 = vmatpush1.bf16.msra.mxu0 %v1328_v3  ;;  %v1360_v8 = vld [vmem:[%s1794_s1 + $0x64] ss:$12 sps:$4 sm:$0xff]   ;;  %v1365_v9 = vld [vmem:[%s1794_s1 + $0x60] ss:$12 sps:$4 sm:$0xff]   ;;  %v1390_v13 = vld [vmem:[%s1794_s1 + $0x48] ss:$12 sps:$4 sm:$0xff]  }
   0x4   :  { %247 = vmatprep.subr.bf16.mxu0 %v1336_v4  ;;  %v1371_v10 = vld [vmem:[%s1794_s1 + $0xb0] ss:$12 sps:$4 sm:$0xff]   ;;  %v1377_v11 = vld [vmem:[%s1794_s1 + $0x4c] ss:$12 sps:$4 sm:$0xff]   ;;  %v1396_v14 = vld [vmem:[%s1794_s1 + $0x34] ss:$12 sps:$4 sm:$0xff]  }
   0x5   :  { %1067 = vmatpush3.bf16.msra.mxu1 %v1371_v10  ;;  %v1383_v12 = vld [vmem:[%s1794_s1 + $0x98] ss:$12 sps:$4 sm:$0xff]   ;;  %v1402_v15 = vld [vmem:[%s1794_s1 + $0x80] ss:$12 sps:$4 sm:$0xff]   ;;  %v1409_v16 = vld [vmem:[%s1794_s1 + $0x30] ss:$12 sps:$4 sm:$0xff]  }
   0x6   :  { %1068 = vmatprep.subr.bf16.mxu1 %v1275_v1  ;;  %v1415_v17 = vld [vmem:[%s1794_s1 + $0x1c] ss:$12 sps:$4 sm:$0xff]   ;;  %v1428_v19 = vld [vmem:[%s1794_s1 + $0x18] ss:$12 sps:$4 sm:$0xff]   ;;  %v1447_v22 = vld [vmem:[%s1794_s1] ss:$12 sps:$4 sm:$0xff]  }
   0x7   :  { %248 = vmatpush1.bf16.msra.mxu0 %v1342_v5  ;;  %v1421_v18 = vld [vmem:[%s1794_s1 + $0x68] ss:$12 sps:$4 sm:$0xff]   ;;  %v1434_v20 = vld [vmem:[%s1794_s1 + $0x4] ss:$12 sps:$4 sm:$0xff]   ;;  %v1463_v24 = vld [vmem:[%s1794_s1 + $0x20] ss:$12 sps:$4 sm:$0xff]  }
   0x8   :  { %249 = vmatprep.subr.bf16.mxu0 %v1348_v6  ;;  %v1440_v21 = vld [vmem:[%s1794_s1 + $0x50] ss:$12 sps:$4 sm:$0xff]   ;;  %v1454_v23 = vld [vmem:[%s1794_s1 + $0x38] ss:$12 sps:$4 sm:$0xff]   ;;  %v1474_v25 = vld [vmem:[%s1794_s1 + $0x8] ss:$12 sps:$4 sm:$0xff]  }
   0x9   :  { %1069 = vmatpush3.bf16.msra.mxu1 %v1383_v12  ;;  %v67_v27 = vshrl.u32 %v66_v26, 7  ;;  %v62_v29 = vld [vmem:[%s1795_s0] ss:$8 sm:$0x7]  ;;  %vm97_vm1 = vcmask 1040384   ;;  %vm882_vm2 = vcmask 523264  }
   0xa   :  { %1070 = vmatprep.subr.bf16.mxu1 %v1275_v1  ;;  %v962_v30 = vld [vmem:[%s1795_s0 + $0x4] ss:$8 sm:$0x7]  ;;  %v61_v31 = vld [vmem:[%s1796_s2] sm:$0x7]  ;;  %vm956_vm3 = vcmask 1024  }
   0xb   :  { %250 = vmatpush1.bf16.msra.mxu0 %v1354_v7  ;;  %v1512_v28 = vsub.s32 0, %v67_v27  ;;  %v1528_v35 = vsub.s32 1, %v67_v27  ;;  %v1539_v57 = vsub.s32 2, %v67_v27 }
   0xc   :  { %251 = vmatprep.subr.bf16.mxu0 %v1360_v8 }
   0xd   :  { %1071 = vmatpush3.bf16.msra.mxu1 %v1402_v15  ;;  %v69_v32 = vrot.slane %v62_v29, %v1512_v28  ;;  %v85_v33 = vrot.slane %v962_v30, %v1512_v28  ;;  %v1526_v34 = vrot.slane %v61_v31, %v1512_v28  ;;  %v1533_v39 = vrot.slane %v61_v31, %v1528_v35 }
   0xe   :  { %1072 = vmatprep.subr.bf16.mxu1 %v1275_v1  ;;  %v73_v40 = vrot.slane %v62_v29, %v1528_v35  ;;  %v89_v41 = vrot.slane %v962_v30, %v1528_v35  ;;  %v1542_v58 = vrot.slane %v61_v31, %v1539_v57  ;;  %v77_v60 = vrot.slane %v62_v29, %v1539_v57 }
   0xf   :  { %252 = vmatpush1.bf16.msra.mxu0 %v1365_v9  ;;  %v98_v36 = vsel %vm97_vm1, %v69_v32, %v85_v33  ;;  %v93_v61 = vrot.slane %v962_v30, %v1539_v57  ;;  %v989_v30 = vld [vmem:[%s1795_s0 + $0x1] ss:$8 sm:$0x7] }
  0x10   :  { %253 = vmatprep.subr.bf16.mxu0 %v1377_v11  ;;  %v99_v47 = vsel %vm97_vm1, %v73_v40, %v89_v41 }
  0x11   :  { %1073 = vmatpush3.bf16.msra.mxu1 %v1421_v18  ;;  %v100_v32 = vsel %vm97_vm1, %v77_v60, %v93_v61 }
  0x12   :  { %1074 = vmatprep.subr.bf16.mxu1 %v1275_v1 }
  0x13   :  { %254 = vmatpush1.bf16.msra.mxu0 %v1390_v13 }
  0x14   :  { %255 = vmatprep.subr.bf16.mxu0 %v1396_v14 }
  0x15   :  { %1075 = vmatpush3.bf16.msra.mxu1 %v1440_v21 }
  0x16   :  { %1076 = vmatprep.subr.bf16.mxu1 %v1275_v1 }
  0x17   :  { %256 = vmatpush1.bf16.msra.mxu0 %v1409_v16 }
  0x18   :  { %257 = vmatprep.subr.bf16.mxu0 %v1415_v17 }
  0x19   :  { %1077 = vmatpush3.bf16.msra.mxu1 %v1454_v23 }
  0x1a   :  { %1078 = vmatprep.subr.bf16.mxu1 %v1275_v1 }
  0x1b   :  { %258 = vmatpush1.bf16.msra.mxu0 %v1428_v19 }
  0x1c   :  { %259 = vmatprep.subr.bf16.mxu0 %v1434_v20 }
  0x1d   :  { %1079 = vmatpush3.bf16.msra.mxu1 %v1463_v24 }
  0x1e   :  { %1080 = vmatprep.subr.bf16.mxu1 %v1275_v1 }
  0x1f   :  { %260 = vmatpush1.bf16.msra.mxu0 %v1447_v22 }
  0x20   :  { %387 = vmatprep.subr.bf16.mxu0 %v1321_v0 }
  0x21   :  { %1081 = vmatpush3.bf16.msra.mxu1 %v1474_v25 }
  0x22   :  { %278 = vmatmul.mubr.bf16.vlgmr.msra.gmra.mxu0 %v1276_v2  ;;  %1086 = vmatprep.subr.bf16.mxu1 %v1275_v1 }
  0x23   :  { %388 = vmatpush1.bf16.msra.mxu0 %v1328_v3  ;;  %419 = vmatprep.mubr.bf16.mxu0 %v1276_v2 }
  0x24   :  { %389 = vmatprep.subr.bf16.mxu0 %v1336_v4  ;;  %1083 = vmatmul.mubr.bf16.vlgmr.msra.gmra.mxu1 %v1276_v2 }
  0x25   :  { %1087 = vmatpush3.bf16.msra.mxu1 %v1371_v10  ;;  %1102 = vmatprep.mubr.msk.bf16.mxu1 %vm1277_vm0, %v1275_v1 }
  0x26   :  { %1088 = vmatprep.subr.bf16.mxu1 %v1275_v1 }
  0x27   :  { %390 = vmatpush1.bf16.msra.mxu0 %v1342_v5 }
  0x28   :  { %391 = vmatprep.subr.bf16.mxu0 %v1348_v6 }
  0x29   :  { %1089 = vmatpush3.bf16.msra.mxu1 %v1383_v12 }
  0x2a   :  { %1090 = vmatprep.subr.bf16.mxu1 %v1275_v1 }
  0x2b   :  { %392 = vmatpush1.bf16.msra.mxu0 %v1354_v7 }
  0x2c   :  { %393 = vmatprep.subr.bf16.mxu0 %v1360_v8 }
  0x2d   :  { %1091 = vmatpush3.bf16.msra.mxu1 %v1402_v15 }
  0x2e   :  { %1092 = vmatprep.subr.bf16.mxu1 %v1275_v1 }
  0x2f   :  { %394 = vmatpush1.bf16.msra.mxu0 %v1365_v9 }
  0x30   :  { %395 = vmatprep.subr.bf16.mxu0 %v1377_v11 }
  0x31   :  { %1093 = vmatpush3.bf16.msra.mxu1 %v1421_v18 }
  0x32   :  { %1094 = vmatprep.subr.bf16.mxu1 %v1275_v1 }
  0x33   :  { %396 = vmatpush1.bf16.msra.mxu0 %v1390_v13 }
  0x34   :  { %397 = vmatprep.subr.bf16.mxu0 %v1396_v14 }
  0x35   :  { %1095 = vmatpush3.bf16.msra.mxu1 %v1440_v21 }
  0x36   :  { %1096 = vmatprep.subr.bf16.mxu1 %v1275_v1 }
  0x37   :  { %398 = vmatpush1.bf16.msra.mxu0 %v1409_v16 }
  0x38   :  { %399 = vmatprep.subr.bf16.mxu0 %v1415_v17 }
  0x39   :  { %1097 = vmatpush3.bf16.msra.mxu1 %v1454_v23 }
  0x3a   :  { %1098 = vmatprep.subr.bf16.mxu1 %v1275_v1 }
  0x3b   :  { %400 = vmatpush1.bf16.msra.mxu0 %v1428_v19 }
  0x3c   :  { %401 = vmatprep.subr.bf16.mxu0 %v1434_v20 }
  0x3d   :  { %1099 = vmatpush3.bf16.msra.mxu1 %v1463_v24 }
  0x3e   :  { %1100 = vmatprep.subr.bf16.mxu1 %v1275_v1 }
  0x3f   :  { %402 = vmatpush1.bf16.msra.mxu0 %v1447_v22 }
  0x40   :  { %529 = vmatprep.subr.bf16.mxu0 %v1321_v0 }
  0x41   :  { %1101 = vmatpush3.bf16.msra.mxu1 %v1474_v25 }
  0x42   :  { %1106 = vmatprep.subr.bf16.mxu1 %v1275_v1 }
  0xe2   :  { %v279_v37 = vpop.f32.mrf.mxu0 }
  0xe3   :  { %v280_v38 = vadd.f32 %v279_v37, %v1526_v34 }
  0xe4   :  { %v281_v42 = vpop.f32.mrf.mxu0  ;;  %v320_v50 = vpop.f32.mrf.mxu1 }
  0xe5   :  { %v326_v43 = vadd.f32 %v280_v38, %v98_v36  ;;  %v282_v46 = vadd.f32 %v281_v42, %v1533_v39  ;;  %v321_v63 = vadd.f32 %v320_v50, %v1542_v58  ;;  %v990_v42 = vld [vmem:[%s1795_s0 + $0x5] ss:$8 sm:$0x7] }
  0xe6   :  { %v283_v44 = vpop.f32.mrf.mxu0  ;;  %v1084_v51 = vpop.f32.mrf.mxu1 }
  0xe7   :  { %v987_v45 = vmul.f32 -1.442695, %v326_v43  ;;  %v333_v49 = vadd.f32 %v282_v46, %v99_v47  ;;  %v355_v43 = vrot.slane %v989_v30, %v1512_v28  ;;  %v371_v44 = vrot.slane %v990_v42, %v1512_v28 }
  0xe8   :  { %v284_v48 = vpop.f32.mrf.mxu0  ;;  %v323_v53 = vpop.f32.mrf.mxu1 }
  0xe9   :  { %1235 = vpow2.f32 %v987_v45  ;;  %v988_v52 = vmul.f32 -1.442695, %v333_v49  ;;  %v383_v45 = vsel %vm97_vm1, %v355_v43, %v371_v44  ;;  %v359_v48 = vrot.slane %v989_v30, %v1528_v35 }
  0xea   :  { %v1085_v54 = vpop.f32.mrf.mxu1  ;;  %v375_v49 = vrot.slane %v990_v42, %v1528_v35 }
  0xeb   :  { %1237 = vpow2.f32 %v988_v52 }
  0xf6   :  { %v1236_v55 = vpop.eup %1235 }
  0xf7   :  { %v330_v56 = vadd.f32 1.0, %v1236_v55 }
  0xf8   :  { %v1238_v59 = vpop.eup %1237 }
  0xf9   :  { %1239 = vrcp.f32 %v330_v56  ;;  %v337_v62 = vadd.f32 1.0, %v1238_v59  ;;  %v384_v59 = vsel %vm97_vm1, %v359_v48, %v375_v49 }
  0xfb   :  { %1241 = vrcp.f32 %v337_v62 }
 0x106   :  { %v1240_v26 = vpop.eup %1239 }
 0x107   :  { %v340_v33 = vmul.f32 %v1240_v26, %v321_v63 }
 0x108   :  { %v1242_v27 = vpop.eup %1241 }
 0x109   :  { %v341_v36 = vadd.f32 %v340_v33, %v100_v32  ;;  %v343_v37 = vsub.f32 1.0, %v1242_v27  ;;  %v345_v40 = vmul.f32 0.0, %v1242_v27  ;;  %v379_v27 = vrot.slane %v990_v42, %v1539_v57 }
 0x10b   :  { %1243 = vtanh.f32 %v341_v36  ;;  %v363_v36 = vrot.slane %v989_v30, %v1539_v57 }
 0x118   :  { %v1244_v38 = vpop.eup %1243 }
 0x119   :  { %v344_v31 = vmul.f32 %v1244_v38, %v343_v37 }
 0x11b   :  { %v1548_v41 = vadd.f32 %v345_v40, %v344_v31  ;;  %v385_v40 = vsel %vm97_vm1, %v363_v36, %v379_v27  ;;  %v786_v36 = vld [vmem:[%s1797_s3 + $0x68] sm:$0xff]  ;;  %v785_v27 = vld [vmem:[%s1797_s3 + $0x60] sm:$0xff] }
 0x11d   :  { %v386_v29 = vpack.c.bf16 %v1548_v41, %v1548_v41 }
 0x11f   :  { %420 = vmatmul.mubr.bf16.vlgmr.msra.gmra.mxu0 %v386_v29  ;;  %1103 = vmatmul.mubr.bf16.vlgmr.msra.gmra.mxu1 %v386_v29 }
 0x120   :  { %530 = vmatpush1.bf16.msra.mxu0 %v1328_v3  ;;  %1107 = vmatpush3.bf16.msra.mxu1 %v1371_v10 }
 0x121   :  { %531 = vmatprep.subr.bf16.mxu0 %v1336_v4  ;;  %1108 = vmatprep.subr.bf16.mxu1 %v1275_v1 }
 0x122   :  { %561 = vmatprep.mubr.bf16.mxu0 %v1276_v2  ;;  %1122 = vmatprep.mubr.msk.bf16.mxu1 %vm1277_vm0, %v1275_v1 }
 0x124   :  { %532 = vmatpush1.bf16.msra.mxu0 %v1342_v5  ;;  %1109 = vmatpush3.bf16.msra.mxu1 %v1383_v12 }
 0x125   :  { %533 = vmatprep.subr.bf16.mxu0 %v1348_v6  ;;  %1110 = vmatprep.subr.bf16.mxu1 %v1275_v1 }
 0x128   :  { %534 = vmatpush1.bf16.msra.mxu0 %v1354_v7  ;;  %1111 = vmatpush3.bf16.msra.mxu1 %v1402_v15 }
 0x129   :  { %535 = vmatprep.subr.bf16.mxu0 %v1360_v8  ;;  %1112 = vmatprep.subr.bf16.mxu1 %v1275_v1 }
 0x12c   :  { %536 = vmatpush1.bf16.msra.mxu0 %v1365_v9  ;;  %1113 = vmatpush3.bf16.msra.mxu1 %v1421_v18 }
 0x12d   :  { %537 = vmatprep.subr.bf16.mxu0 %v1377_v11  ;;  %1114 = vmatprep.subr.bf16.mxu1 %v1275_v1 }
 0x130   :  { %538 = vmatpush1.bf16.msra.mxu0 %v1390_v13  ;;  %1115 = vmatpush3.bf16.msra.mxu1 %v1440_v21 }
 0x131   :  { %539 = vmatprep.subr.bf16.mxu0 %v1396_v14  ;;  %1116 = vmatprep.subr.bf16.mxu1 %v1275_v1 }
 0x134   :  { %540 = vmatpush1.bf16.msra.mxu0 %v1409_v16  ;;  %1117 = vmatpush3.bf16.msra.mxu1 %v1454_v23 }
 0x135   :  { %541 = vmatprep.subr.bf16.mxu0 %v1415_v17  ;;  %1118 = vmatprep.subr.bf16.mxu1 %v1275_v1 }
 0x138   :  { %542 = vmatpush1.bf16.msra.mxu0 %v1428_v19  ;;  %1119 = vmatpush3.bf16.msra.mxu1 %v1463_v24 }
 0x139   :  { %543 = vmatprep.subr.bf16.mxu0 %v1434_v20  ;;  %1120 = vmatprep.subr.bf16.mxu1 %v1275_v1 }
 0x13c   :  { %544 = vmatpush1.bf16.msra.mxu0 %v1447_v22  ;;  %1121 = vmatpush3.bf16.msra.mxu1 %v1474_v25 }
 0x13d   :  { %671 = vmatprep.subr.bf16.mxu0 %v1321_v0  ;;  %1126 = vmatprep.subr.bf16.mxu1 %v1275_v1 }
 0x1df   :  { %v421_v46 = vpop.f32.mrf.mxu0  ;;  %v462_v47 = vpop.f32.mrf.mxu1 }
 0x1e0   :  { %v422_v0 = vadd.f32 %v421_v46, %v1526_v34  ;;  %v463_v38 = vadd.f32 %v462_v47, %v1542_v58 }
 0x1e1   :  { %v423_v50 = vpop.f32.mrf.mxu0  ;;  %v1104_v51 = vpop.f32.mrf.mxu1 }
 0x1e2   :  { %v468_v52 = vadd.f32 %v422_v0, %v383_v45  ;;  %v424_v56 = vadd.f32 %v423_v50, %v1533_v39 }
 0x1e3   :  { %v425_v53 = vpop.f32.mrf.mxu0  ;;  %v465_v54 = vpop.f32.mrf.mxu1 }
 0x1e4   :  { %v991_v55 = vmul.f32 -1.442695, %v468_v52  ;;  %v475_v62 = vadd.f32 %v424_v56, %v384_v59 }
 0x1e5   :  { %v426_v60 = vpop.f32.mrf.mxu0  ;;  %v1105_v61 = vpop.f32.mrf.mxu1 }
 0x1e6   :  { %1245 = vpow2.f32 %v991_v55  ;;  %v992_v63 = vmul.f32 -1.442695, %v475_v62 }
 0x1e8   :  { %1247 = vpow2.f32 %v992_v63 }
 0x1f3   :  { %v1246_v26 = vpop.eup %1245 }
 0x1f4   :  { %v472_v32 = vadd.f32 1.0, %v1246_v26 }
 0x1f5   :  { %v1248_v33 = vpop.eup %1247 }
 0x1f6   :  { %1249 = vrcp.f32 %v472_v32  ;;  %v479_v37 = vadd.f32 1.0, %v1248_v33  ;;  %v788_v32 = vld [vmem:[%s1797_s3 + $0x78] sm:$0xff]  ;;  %v787_v33 = vld [vmem:[%s1797_s3 + $0x70] sm:$0xff] }
 0x1f8   :  { %1251 = vrcp.f32 %v479_v37  ;;  %v784_v37 = vld [vmem:[%s1797_s3 + $0x58] sm:$0xff] }
 0x203   :  { %v1250_v31 = vpop.eup %1249 }
 0x204   :  { %v482_v29 = vmul.f32 %v1250_v31, %v463_v38  ;;  %v783_v38 = vld [vmem:[%s1797_s3 + $0x50] sm:$0xff]  ;;  %v782_v31 = vld [vmem:[%s1797_s3 + $0x48] sm:$0xff] }
 0x205   :  { %v1252_v44 = vpop.eup %1251 }
 0x206   :  { %v483_v43 = vadd.f32 %v482_v29, %v385_v40  ;;  %v485_v45 = vsub.f32 1.0, %v1252_v44  ;;  %v487_v48 = vmul.f32 %v1252_v44, %v1548_v41  ;;  %v781_v40 = vld [vmem:[%s1797_s3 + $0x40] sm:$0xff]  ;;  %v780_v29 = vld [vmem:[%s1797_s3 + $0x38] sm:$0xff]  ;;  %v778_v44 = vld [vmem:[%s1797_s3 + $0x28] sm:$0xff] }
 0x208   :  { %1253 = vtanh.f32 %v483_v43  ;;  %v779_v43 = vld [vmem:[%s1797_s3 + $0x30] sm:$0xff] }
 0x215   :  { %v1254_v46 = vpop.eup %1253 }
 0x216   :  { %v486_v0 = vmul.f32 %v1254_v46, %v485_v45  ;;  %v777_v45 = vld [vmem:[%s1797_s3 + $0x20] sm:$0xff]  ;;  %v776_v46 = vld [vmem:[%s1797_s3 + $0x18] sm:$0xff] }
 0x218   :  { %v1606_v49 = vadd.f32 %v487_v48, %v486_v0  ;;  %v775_v0 = vld [vmem:[%s1797_s3 + $0x10] sm:$0xff]  ;;  %v774_v48 = vld [vmem:[%s1797_s3 + $0x8] sm:$0xff] }
 0x21a   :  { %v528_v30 = vpack.c.bf16 %v1606_v49, %v1606_v49 }
 0x21c   :  { %562 = vmatmul.mubr.bf16.vlgmr.msra.gmra.mxu0 %v528_v30  ;;  %1123 = vmatmul.mubr.bf16.vlgmr.msra.gmra.mxu1 %v528_v30  ;;  %v874_v30 = vld [vmem:[%s1798_s5 + $0x38] sm:$0xff] }
 0x21d   :  { %672 = vmatpush1.bf16.msra.mxu0 %v1328_v3  ;;  %1127 = vmatpush3.bf16.msra.mxu1 %v1371_v10  ;;  %v994_v3 = vld [vmem:[%s1795_s0 + $0x6] ss:$8 sm:$0x7] }
 0x21e   :  { %673 = vmatprep.subr.bf16.mxu0 %v1336_v4  ;;  %1128 = vmatprep.subr.bf16.mxu1 %v1275_v1  ;;  %v521_v47 = vrot.slane %v994_v3, %v1539_v57 }
 0x21f   :  { %703 = vmatprep.mubr.bf16.mxu0 %v1276_v2  ;;  %1142 = vmatprep.mubr.msk.bf16.mxu1 %vm1277_vm0, %v1275_v1  ;;  %v993_v2 = vld [vmem:[%s1795_s0 + $0x2] ss:$8 sm:$0x7] }
 0x220   :  { %v497_v4 = vrot.slane %v993_v2, %v1512_v28  ;;  %v501_v10 = vrot.slane %v993_v2, %v1528_v35  ;;  %v505_v42 = vrot.slane %v993_v2, %v1539_v57  ;;  %v873_v2 = vld [vmem:[%s1798_s5 + $0x30] sm:$0xff] }
 0x221   :  { %674 = vmatpush1.bf16.msra.mxu0 %v1342_v5  ;;  %1129 = vmatpush3.bf16.msra.mxu1 %v1383_v12  ;;  %v513_v5 = vrot.slane %v994_v3, %v1512_v28 }
 0x222   :  { %675 = vmatprep.subr.bf16.mxu0 %v1348_v6  ;;  %1130 = vmatprep.subr.bf16.mxu1 %v1275_v1  ;;  %v527_v53 = vsel %vm97_vm1, %v505_v42, %v521_v47 }
 0x223   :  { %v525_v6 = vsel %vm97_vm1, %v497_v4, %v513_v5  ;;  %v871_v4 = vld [vmem:[%s1798_s5 + $0x20] sm:$0xff]  ;;  %v870_v5 = vld [vmem:[%s1798_s5 + $0x18] sm:$0xff] }
 0x225   :  { %676 = vmatpush1.bf16.msra.mxu0 %v1354_v7  ;;  %1131 = vmatpush3.bf16.msra.mxu1 %v1402_v15 }
 0x226   :  { %677 = vmatprep.subr.bf16.mxu0 %v1360_v8  ;;  %1132 = vmatprep.subr.bf16.mxu1 %v1275_v1 }
 0x229   :  { %678 = vmatpush1.bf16.msra.mxu0 %v1365_v9  ;;  %1133 = vmatpush3.bf16.msra.mxu1 %v1421_v18 }
 0x22a   :  { %679 = vmatprep.subr.bf16.mxu0 %v1377_v11  ;;  %1134 = vmatprep.subr.bf16.mxu1 %v1275_v1  ;;  %v517_v11 = vrot.slane %v994_v3, %v1528_v35  ;;  %v872_v3 = vld [vmem:[%s1798_s5 + $0x28] sm:$0xff] }
 0x22d   :  { %680 = vmatpush1.bf16.msra.mxu0 %v1390_v13  ;;  %1135 = vmatpush3.bf16.msra.mxu1 %v1440_v21 }
 0x22e   :  { %681 = vmatprep.subr.bf16.mxu0 %v1396_v14  ;;  %1136 = vmatprep.subr.bf16.mxu1 %v1275_v1 }
 0x231   :  { %682 = vmatpush1.bf16.msra.mxu0 %v1409_v16  ;;  %1137 = vmatpush3.bf16.msra.mxu1 %v1454_v23 }
 0x232   :  { %683 = vmatprep.subr.bf16.mxu0 %v1415_v17  ;;  %1138 = vmatprep.subr.bf16.mxu1 %v1275_v1 }
 0x235   :  { %684 = vmatpush1.bf16.msra.mxu0 %v1428_v19  ;;  %1139 = vmatpush3.bf16.msra.mxu1 %v1463_v24  ;;  %v526_v19 = vsel %vm97_vm1, %v501_v10, %v517_v11 }
 0x236   :  { %685 = vmatprep.subr.bf16.mxu0 %v1434_v20  ;;  %1140 = vmatprep.subr.bf16.mxu1 %v1275_v1 }
 0x239   :  { %686 = vmatpush1.bf16.msra.mxu0 %v1447_v22  ;;  %1141 = vmatpush3.bf16.msra.mxu1 %v1474_v25 }
 0x23a   :  { %1146 = vmatprep.subr.mxu0 %v1275_v1  ;;  %1181 = vmatprep.subr.mxu1 %v1275_v1 }
 0x2dc   :  { %v563_v7 = vpop.f32.mrf.mxu0  ;;  %v604_v8 = vpop.f32.mrf.mxu1 }
 0x2dd   :  { %v564_v9 = vadd.f32 %v563_v7, %v1526_v34  ;;  %v605_v51 = vadd.f32 %v604_v8, %v1542_v58  ;;  %v998_v7 = vld [vmem:[%s1795_s0 + $0x7] ss:$8 sm:$0x7] }
 0x2de   :  { %v565_v12 = vpop.f32.mrf.mxu0  ;;  %v1124_v13 = vpop.f32.mrf.mxu1 }
 0x2df   :  { %v610_v14 = vadd.f32 %v564_v9, %v525_v6  ;;  %v566_v18 = vadd.f32 %v565_v12, %v1533_v39  ;;  %v997_v6 = vld [vmem:[%s1795_s0 + $0x3] ss:$8 sm:$0x7]  ;;  %v655_v9 = vrot.slane %v998_v7, %v1512_v28 }
 0x2e0   :  { %v567_v15 = vpop.f32.mrf.mxu0  ;;  %v607_v16 = vpop.f32.mrf.mxu1  ;;  %v639_v8 = vrot.slane %v997_v6, %v1512_v28  ;;  %v647_v47 = vrot.slane %v997_v6, %v1539_v57 }
 0x2e1   :  { %v995_v17 = vmul.f32 -1.442695, %v610_v14  ;;  %v617_v22 = vadd.f32 %v566_v18, %v526_v19  ;;  %v643_v14 = vrot.slane %v997_v6, %v1528_v35  ;;  %v659_v15 = vrot.slane %v998_v7, %v1528_v35 }
 0x2e2   :  { %v568_v20 = vpop.f32.mrf.mxu0  ;;  %v1125_v21 = vpop.f32.mrf.mxu1  ;;  %v667_v10 = vsel %vm97_vm1, %v639_v8, %v655_v9 }
 0x2e3   :  { %1255 = vpow2.f32 %v995_v17  ;;  %v996_v23 = vmul.f32 -1.442695, %v617_v22  ;;  %v668_v28 = vsel %vm97_vm1, %v643_v14, %v659_v15 }
 0x2e5   :  { %1257 = vpow2.f32 %v996_v23 }
 0x2f0   :  { %v1256_v24 = vpop.eup %1255 }
 0x2f1   :  { %v614_v25 = vadd.f32 1.0, %v1256_v24 }
 0x2f2   :  { %v1258_v41 = vpop.eup %1257 }
 0x2f3   :  { %1259 = vrcp.f32 %v614_v25  ;;  %v621_v50 = vadd.f32 1.0, %v1258_v41 }
 0x2f5   :  { %1261 = vrcp.f32 %v621_v50  ;;  %v663_v50 = vrot.slane %v998_v7, %v1539_v57  ;;  %v869_v57 = vld [vmem:[%s1798_s5 + $0x10] sm:$0xff] }
 0x300   :  { %v1260_v52 = vpop.eup %1259 }
 0x301   :  { %v624_v54 = vmul.f32 %v1260_v52, %v605_v51 }
 0x302   :  { %v1262_v56 = vpop.eup %1261 }
 0x303   :  { %v625_v55 = vadd.f32 %v624_v54, %v527_v53  ;;  %v627_v59 = vsub.f32 1.0, %v1262_v56  ;;  %v629_v62 = vmul.f32 %v1262_v56, %v1606_v49  ;;  %v773_v49 = vld [vmem:[%s1797_s3] sm:$0xff]  ;;  %v669_v53 = vsel %vm97_vm1, %v647_v47, %v663_v50 }
 0x305   :  { %1263 = vtanh.f32 %v625_v55 }
 0x312   :  { %v1264_v60 = vpop.eup %1263 }
 0x313   :  { %v628_v61 = vmul.f32 %v1264_v60, %v627_v59 }
 0x315   :  { %v1664_v63 = vadd.f32 %v629_v62, %v628_v61 }
 0x317   :  { %v670_v26 = vpack.c.bf16 %v1664_v63, %v1664_v63 }
 0x319   :  { %704 = vmatmul.mubr.bf16.vlgmr.msra.gmra.mxu0 %v670_v26  ;;  %1143 = vmatmul.mubr.bf16.vlgmr.msra.gmra.mxu1 %v670_v26 }
 0x31a   :  { %1178 = vmatprep.mubr.msk.f32.mxu0 %vm1277_vm0, %v1275_v1  ;;  %1197 = vmatprep.mubr.msk.f32.mxu1 %vm1277_vm0, %v1275_v1 }
 0x31b   :  { %1147 = vmatpush3.msra.mxu0 %v788_v32  ;;  %1182 = vmatpush3.msra.mxu1 %v874_v30  ;;  %v12_v32 = vstv %s1799_s6 }
 0x31c   :  { %1148 = vmatprep.subr.mxu0 %v1275_v1  ;;  %1183 = vmatprep.subr.mxu1 %v1275_v1  ;;  %13 = vst [vmem:[#allocation2] sm:$0x1] %v12_v32 }
 0x31d   :  { %1149 = vmatpush3.msra.mxu0 %v787_v33  ;;  %1184 = vmatpush3.msra.mxu1 %v873_v2  ;;  %v1001_v33 = vld [vmem:[%s1800_s4] ss:$0 sm:$0xff] }
 0x31e   :  { %1150 = vmatprep.subr.mxu0 %v1275_v1  ;;  %1185 = vmatprep.subr.mxu1 %v1275_v1 }
 0x31f   :  { %1151 = vmatpush3.msra.mxu0 %v786_v36  ;;  %1186 = vmatpush3.msra.mxu1 %v872_v3 }
 0x320   :  { %1152 = vmatprep.subr.mxu0 %v1275_v1  ;;  %1187 = vmatprep.subr.mxu1 %v1275_v1 }
 0x321   :  { %1153 = vmatpush3.msra.mxu0 %v785_v27  ;;  %1188 = vmatpush3.msra.mxu1 %v871_v4 }
 0x322   :  { %1154 = vmatprep.subr.mxu0 %v1275_v1  ;;  %1189 = vmatprep.subr.mxu1 %v1275_v1 }
 0x323   :  { %1155 = vmatpush3.msra.mxu0 %v784_v37  ;;  %1190 = vmatpush3.msra.mxu1 %v870_v5 }
 0x324   :  { %1156 = vmatprep.subr.mxu0 %v1275_v1  ;;  %1191 = vmatprep.subr.mxu1 %v1275_v1 }
 0x325   :  { %1157 = vmatpush3.msra.mxu0 %v783_v38  ;;  %1192 = vmatpush3.msra.mxu1 %v869_v57 }
 0x326   :  { %1158 = vmatprep.subr.mxu0 %v1275_v1  ;;  %1193 = vmatprep.subr.mxu1 %v1275_v1 }
 0x327   :  { %1159 = vmatpush3.msra.mxu0 %v782_v31 }
 0x328   :  { %1160 = vmatprep.subr.mxu0 %v1275_v1 }
 0x329   :  { %1161 = vmatpush3.msra.mxu0 %v781_v40 }
 0x32a   :  { %1162 = vmatprep.subr.mxu0 %v1275_v1 }
 0x32b   :  { %1163 = vmatpush3.msra.mxu0 %v780_v29 }
 0x32c   :  { %1164 = vmatprep.subr.mxu0 %v1275_v1 }
 0x32d   :  { %1165 = vmatpush3.msra.mxu0 %v779_v43 }
 0x32e   :  { %1166 = vmatprep.subr.mxu0 %v1275_v1 }
 0x32f   :  { %1167 = vmatpush3.msra.mxu0 %v778_v44 }
 0x330   :  { %1168 = vmatprep.subr.mxu0 %v1275_v1 }
 0x331   :  { %1169 = vmatpush3.msra.mxu0 %v777_v45 }
 0x332   :  { %1170 = vmatprep.subr.mxu0 %v1275_v1 }
 0x333   :  { %1171 = vmatpush3.msra.mxu0 %v776_v46 }
 0x334   :  { %1172 = vmatprep.subr.mxu0 %v1275_v1 }
 0x335   :  { %1173 = vmatpush3.msra.mxu0 %v775_v0 }
 0x336   :  { %1174 = vmatprep.subr.mxu0 %v1275_v1 }
 0x337   :  { %1175 = vmatpush3.msra.mxu0 %v774_v48 }
 0x338   :  { %1176 = vmatprep.subr.mxu0 %v1275_v1 }
 0x339   :  { %1177 = vmatpush3.msra.mxu0 %v773_v49 }
 0x3d9   :  { %v705_v11 = vpop.f32.mrf.mxu0  ;;  %v746_v12 = vpop.f32.mrf.mxu1 }
 0x3da   :  { %v706_v13 = vadd.f32 %v705_v11, %v1526_v34  ;;  %v747_v52 = vadd.f32 %v746_v12, %v1542_v58  ;;  %v868_v58 = vld [vmem:[%s1798_s5 + $0x8] sm:$0xff] }
 0x3db   :  { %v707_v16 = vpop.f32.mrf.mxu0  ;;  %v1144_v17 = vpop.f32.mrf.mxu1  ;;  %1194 = vmatpush3.msra.mxu1 %v868_v58 }
 0x3dc   :  { %v752_v18 = vadd.f32 %v706_v13, %v667_v10  ;;  %v708_v22 = vadd.f32 %v707_v16, %v1533_v39  ;;  %1195 = vmatprep.subr.mxu1 %v1275_v1  ;;  %v1002_v1 = vld [vmem:[#allocation2] ss:$0 sm:$0xff] }
 0x3dd   :  { %v709_v19 = vpop.f32.mrf.mxu0  ;;  %v749_v20 = vpop.f32.mrf.mxu1 }
 0x3de   :  { %v999_v21 = vmul.f32 -1.442695, %v752_v18  ;;  %v759_v25 = vadd.f32 %v708_v22, %v668_v28 }
 0x3df   :  { %v710_v23 = vpop.f32.mrf.mxu0  ;;  %v1145_v24 = vpop.f32.mrf.mxu1 }
 0x3e0   :  { %1265 = vpow2.f32 %v999_v21  ;;  %v1000_v41 = vmul.f32 -1.442695, %v759_v25 }
 0x3e2   :  { %1267 = vpow2.f32 %v1000_v41 }
 0x3ed   :  { %v1266_v34 = vpop.eup %1265 }
 0x3ee   :  { %v756_v42 = vadd.f32 1.0, %v1266_v34 }
 0x3ef   :  { %v1268_v35 = vpop.eup %1267 }
 0x3f0   :  { %1269 = vrcp.f32 %v756_v42  ;;  %v763_v51 = vadd.f32 1.0, %v1268_v35 }
 0x3f2   :  { %1271 = vrcp.f32 %v763_v51 }
 0x3fd   :  { %v1270_v39 = vpop.eup %1269 }
 0x3fe   :  { %v766_v54 = vmul.f32 %v1270_v39, %v747_v52 }
 0x3ff   :  { %v1272_v56 = vpop.eup %1271 }
 0x400   :  { %v767_v55 = vadd.f32 %v766_v54, %v669_v53  ;;  %v769_v59 = vsub.f32 1.0, %v1272_v56  ;;  %v771_v62 = vmul.f32 %v1272_v56, %v1664_v63  ;;  %v867_v63 = vld [vmem:[%s1798_s5] sm:$0xff] }
 0x401   :  { %1196 = vmatpush3.msra.mxu1 %v867_v63 }
 0x402   :  { %1273 = vtanh.f32 %v767_v55 }
 0x40f   :  { %v1274_v60 = vpop.eup %1273 }
 0x410   :  { %v770_v61 = vmul.f32 %v1274_v60, %v769_v59 }
 0x412   :  { %v772_v26 = vadd.f32 %v771_v62, %v770_v61 }
 0x414   :  { %1179 = vmatmul.mubr.f32.vlgmr.msra.gmra.mxu0 %v772_v26 }
 0x4d4   :  { %v862_v36 = vpop.f32.mrf.mxu0 }
 0x4d5   :  { %v863_v27 = vadd.f32 %v1001_v33, %v862_v36 }
 0x4d6   :  { %v1180_v37 = vpop.f32.mrf.mxu0 }
 0x4d7   :  { %v866_v38 = vmax.f32 %v863_v27, 0.0 }
 0x4d9   :  { %1198 = vmatmul.mubr.msk.f32.vlgmr.msra.gmra.mxu1 %vm882_vm2, %v866_v38 }
 0x599   :  { %v952_v31 = vpop.f32.mrf.mxu1 }
 0x59a   :  { %v953_v40 = vadd.f32 %v1002_v1, %v952_v31 }
 0x59b   :  { %v1199_v29 = vpop.f32.mrf.mxu1 }
 0x59c   :  { %957 = vst.msk [vmem:[%s1801_s7] sm:$0x3] %vm956_vm3, %v953_v40 }

// kernel: deepfake_detector_forward.2
= control target key start
LH: loop header
LB: loop body
LE: loop exit
PB: predicated region body
PF: predicated region fallthrough
CT: control target
= control target key end

     0   :  { %vm119_vm0 = vcmask 1044480   ;;  %vm120_vm1 = vcmask 1045504   ;;  %v4088_v1 = vmov 0   ;;  %v4089_v2 = vmov 65535   ;;  %s5357_s0 = inlined_call_operand.vmem [shape: bf16[27,512], index: 0, kind: input, shape index: {}]   ;;  %s5358_s1 = inlined_call_operand.vmem [shape: bf16[32,27], index: 1, kind: input, shape index: {}]   ;;  %s5359_s2 = inlined_call_operand.vmem [shape: f32[32,1], index: 2, kind: input, shape index: {}]   ;;  %s5360_s5 = inlined_call_operand.vmem [shape: f32[512,8], index: 5, kind: input, shape index: {}]   ;;  %s5361_s3 = inlined_call_operand.vmem [shape: bf16[32,1280], index: 3, kind: input, shape index: {}]   ;;  %s5362_s6 = inlined_call_operand.vmem [shape: bf16[1280,384], index: 6, kind: input, shape index: {}]   ;;  %s5363_s4 = inlined_call_operand.vmem [shape: f32[1,1280], index: 4, kind: input, shape index: {}]   ;;  %s5364_s7 = inlined_call_operand.vmem [shape: f32[1,384], index: 7, kind: input, shape index: {}]   ;;  %s5365_s8 = inlined_call_operand.vmem [shape: f32[8,384], index: 8, kind: output, shape index: {}]  }
   0x1   :  { %v3620_v0 = vld [vmem:[%s5357_s0 + $0x24] ss:$16 sps:$4 sm:$0x3f]   ;;  %167 = vmatprep.mubr.bf16.mxu0 %v4088_v1  ;;  %3618 = vset.pattern.permute.xlu0 %v4088_v1  ;;  %v121_v3 = vsel %vm119_vm0, 4294967295, %v4089_v2  ;;  %v3625_v11 = vld [vmem:[%s5357_s0] ss:$16 sps:$4 sm:$0xff]  }
   0x2   :  { %v3622_v4 = vld [vmem:[%s5357_s0 + $0x20] ss:$16 sps:$4 sm:$0x3f]   ;;  %3619 = vset.pattern.permute.xlu1 %v4088_v1  ;;  %v122_v5 = vsel %vm120_vm1, %v121_v3, 0  ;;  %v3623_v6 = vld [vmem:[%s5357_s0 + $0x4] ss:$16 sps:$4 sm:$0xff]  }
   0x3   :  { %v127_v7 = vand.u32 %v3620_v0, %v122_v5  ;;  %v124_v8 = vand.u32 %v3622_v4, %v122_v5  ;;  %v3627_v9 = vld [vmem:[%s5357_s0 + $0x28] ss:$16 sps:$4 sm:$0x3f]   ;;  %v3629_v10 = vld [vmem:[%s5357_s0 + $0x2c] ss:$16 sps:$4 sm:$0x3f]  }
   0x4   :  { %v133_v12 = vand.u32 %v3629_v10, %v122_v5  ;;  %v42_v13 = vld [vmem:[%s5359_s2] sm:$0xff]  ;;  %v44_v14 = vld [vmem:[%s5359_s2 + $0x10] sm:$0xff]  ;;  %v43_v16 = vld [vmem:[%s5359_s2 + $0x8] sm:$0xff]  ;;  %vm112_vm2 = vcmask 220160   ;;  %v130_v17 = vand.u32 %v3627_v9, %v122_v5  ;;  %vm794_vm3 = vcmask 261120  }
   0x5   :  { %147 = vmatprep.subr.bf16.mxu0 %v127_v7  ;;  %48 = vperm.xlu0 %3618, %v42_v13   ;;  %v3626_v15 = vld [vmem:[%s5358_s1] sm:$0xff]   ;;  %v45_v18 = vld [vmem:[%s5359_s2 + $0x18] sm:$0xff]  ;;  %v3630_v21 = vld [vmem:[%s5358_s1 + $0x8] sm:$0xff]  }
   0x6   :  { %148 = vmatpush1.bf16.msra.mxu0 %v124_v8  ;;  %58 = vperm.xlu1 %3619, %v44_v14   ;;  %v3633_v19 = vld [vmem:[%s5357_s0 + $0xc] ss:$16 sps:$4 sm:$0xff]   ;;  %v3631_v20 = vld [vmem:[%s5357_s0 + $0x8] ss:$16 sps:$4 sm:$0xff]   ;;  %v383_v24 = vld [vmem:[%s5360_s5 + $0xf0] sm:$0xff] }
   0x7   :  { %149 = vmatprep.subr.bf16.mxu0 %v3623_v6  ;;  %v384_v22 = vld [vmem:[%s5360_s5 + $0xf8] sm:$0xff]  ;;  %v367_v25 = vld [vmem:[%s5360_s5 + $0x70] sm:$0xff]  ;;  %v382_v26 = vld [vmem:[%s5360_s5 + $0xe8] sm:$0xff] }
   0x8   :  { %v368_v23 = vld [vmem:[%s5360_s5 + $0x78] sm:$0xff]  ;;  %v366_v27 = vld [vmem:[%s5360_s5 + $0x68] sm:$0xff]  ;;  %v381_v28 = vld [vmem:[%s5360_s5 + $0xe0] sm:$0xff] }
   0x9   :  { %53 = vperm.xlu0 %3618, %v43_v16   ;;  %v365_v29 = vld [vmem:[%s5360_s5 + $0x60] sm:$0xff]  ;;  %v380_v30 = vld [vmem:[%s5360_s5 + $0xd8] sm:$0xff]  ;;  %v379_v32 = vld [vmem:[%s5360_s5 + $0xd0] sm:$0xff] }
   0xa   :  { %150 = vmatpush1.bf16.msra.mxu0 %v3625_v11  ;;  %63 = vperm.xlu1 %3619, %v45_v18   ;;  %v364_v31 = vld [vmem:[%s5360_s5 + $0x58] sm:$0xff]  ;;  %v363_v33 = vld [vmem:[%s5360_s5 + $0x50] sm:$0xff]  ;;  %v378_v34 = vld [vmem:[%s5360_s5 + $0xc8] sm:$0xff] }
   0xb   :  { %200 = vmatprep.subr.bf16.mxu0 %v133_v12  ;;  %v362_v35 = vld [vmem:[%s5360_s5 + $0x48] sm:$0xff]  ;;  %v377_v36 = vld [vmem:[%s5360_s5 + $0xc0] sm:$0xff]  ;;  %v376_v38 = vld [vmem:[%s5360_s5 + $0xb8] sm:$0xff] }
   0xc   :  { %v361_v37 = vld [vmem:[%s5360_s5 + $0x40] sm:$0xff]  ;;  %v416_v39 = vld [vmem:[%s5360_s5 + $0x1f8] sm:$0xff]  ;;  %v375_v42 = vld [vmem:[%s5360_s5 + $0xb0] sm:$0xff] }
   0xd   :  { %3122 = vmatmul.mubr.msk.bf16.vlgmr.msra.gmra.mxu0 %vm112_vm2, %v3626_v15  ;;  %3461 = vmatprep.subr.mxu1 %v416_v39  ;;  %v360_v40 = vld [vmem:[%s5360_s5 + $0x38] sm:$0xff]  ;;  %v415_v43 = vld [vmem:[%s5360_s5 + $0x1f0] sm:$0xff]  ;;  %v374_v46 = vld [vmem:[%s5360_s5 + $0xa8] sm:$0xff] }
   0xe   :  { %201 = vmatpush1.bf16.msra.mxu0 %v130_v17  ;;  %177 = vmatprep.mubr.bf16.mxu0 %v4088_v1  ;;  %v400_v41 = vld [vmem:[%s5360_s5 + $0x178] sm:$0xff]  ;;  %v359_v44 = vld [vmem:[%s5360_s5 + $0x30] sm:$0xff]  ;;  %v414_v47 = vld [vmem:[%s5360_s5 + $0x1e8] sm:$0xff] }
   0xf   :  { %202 = vmatprep.subr.bf16.mxu0 %v3633_v19  ;;  %3462 = vmatpush3.msra.mxu1 %v400_v41  ;;  %v399_v45 = vld [vmem:[%s5360_s5 + $0x170] sm:$0xff]  ;;  %v358_v48 = vld [vmem:[%s5360_s5 + $0x28] sm:$0xff]  ;;  %v373_v50 = vld [vmem:[%s5360_s5 + $0xa0] sm:$0xff] }
  0x10   :  { %3463 = vmatprep.subr.mxu1 %v415_v43  ;;  %v398_v49 = vld [vmem:[%s5360_s5 + $0x168] sm:$0xff]  ;;  %v413_v51 = vld [vmem:[%s5360_s5 + $0x1e0] sm:$0xff]  ;;  %v372_v54 = vld [vmem:[%s5360_s5 + $0x98] sm:$0xff] }
  0x11   :  { %3464 = vmatpush3.msra.mxu1 %v399_v45  ;;  %v357_v52 = vld [vmem:[%s5360_s5 + $0x20] sm:$0xff]  ;;  %v412_v55 = vld [vmem:[%s5360_s5 + $0x1d8] sm:$0xff]  ;;  %v371_v58 = vld [vmem:[%s5360_s5 + $0x90] sm:$0xff] }
  0x12   :  { %203 = vmatpush1.bf16.msra.mxu0 %v3631_v20  ;;  %3465 = vmatprep.subr.mxu1 %v414_v47  ;;  %v397_v53 = vld [vmem:[%s5360_s5 + $0x160] sm:$0xff]  ;;  %v356_v56 = vld [vmem:[%s5360_s5 + $0x18] sm:$0xff]  ;;  %v411_v59 = vld [vmem:[%s5360_s5 + $0x1d0] sm:$0xff] }
  0x13   :  { %3417 = vmatprep.subr.mxu0 %v384_v22  ;;  %3466 = vmatpush3.msra.mxu1 %v398_v49  ;;  %v396_v57 = vld [vmem:[%s5360_s5 + $0x158] sm:$0xff]  ;;  %v355_v60 = vld [vmem:[%s5360_s5 + $0x10] sm:$0xff]  ;;  %v370_v62 = vld [vmem:[%s5360_s5 + $0x88] sm:$0xff] }
  0x14   :  { %3467 = vmatprep.subr.mxu1 %v413_v51  ;;  %v395_v61 = vld [vmem:[%s5360_s5 + $0x150] sm:$0xff]  ;;  %v410_v63 = vld [vmem:[%s5360_s5 + $0x1c8] sm:$0xff]  ;;  %v369_v3 = vld [vmem:[%s5360_s5 + $0x80] sm:$0xff] }
  0x15   :  { %3123 = vmatmul.mubr.msk.bf16.gmra.mxu0 %vm112_vm2, %v3630_v21  ;;  %3468 = vmatpush3.msra.mxu1 %v397_v53  ;;  %v354_v0 = vld [vmem:[%s5360_s5 + $0x8] sm:$0xff]  ;;  %v409_v4 = vld [vmem:[%s5360_s5 + $0x1c0] sm:$0xff]  ;;  %v408_v7 = vld [vmem:[%s5360_s5 + $0x1b8] sm:$0xff] }
  0x16   :  { %220 = vmatprep.mubr.bf16.mxu0 %v4088_v1  ;;  %3469 = vmatprep.subr.mxu1 %v412_v55  ;;  %v394_v2 = vld [vmem:[%s5360_s5 + $0x148] sm:$0xff]  ;;  %v353_v5 = vld [vmem:[%s5360_s5] sm:$0xff]  ;;  %v392_v8 = vld [vmem:[%s5360_s5 + $0x138] sm:$0xff] }
  0x17   :  { %3470 = vmatpush3.msra.mxu1 %v396_v57  ;;  %v393_v6 = vld [vmem:[%s5360_s5 + $0x140] sm:$0xff]  ;;  %v407_v9 = vld [vmem:[%s5360_s5 + $0x1b0] sm:$0xff]  ;;  %v406_v11 = vld [vmem:[%s5360_s5 + $0x1a8] sm:$0xff] }
  0x18   :  { %3471 = vmatprep.subr.mxu1 %v411_v59  ;;  %v391_v10 = vld [vmem:[%s5360_s5 + $0x130] sm:$0xff]  ;;  %v390_v12 = vld [vmem:[%s5360_s5 + $0x128] sm:$0xff]  ;;  %v405_v13 = vld [vmem:[%s5360_s5 + $0x1a0] sm:$0xff] }
  0x19   :  { %3472 = vmatpush3.msra.mxu1 %v395_v61  ;;  %v389_v14 = vld [vmem:[%s5360_s5 + $0x120] sm:$0xff]  ;;  %v388_v16 = vld [vmem:[%s5360_s5 + $0x118] sm:$0xff]  ;;  %v403_v17 = vld [vmem:[%s5360_s5 + $0x190] sm:$0xff] }
  0x1a   :  { %3473 = vmatprep.subr.mxu1 %v410_v63  ;;  %v387_v18 = vld [vmem:[%s5360_s5 + $0x110] sm:$0xff]  ;;  %v402_v19 = vld [vmem:[%s5360_s5 + $0x188] sm:$0xff]  ;;  %v385_v22 = vld [vmem:[%s5360_s5 + $0x100] sm:$0xff] }
  0x1b   :  { %3474 = vmatpush3.msra.mxu1 %v394_v2  ;;  %v386_v20 = vld [vmem:[%s5360_s5 + $0x108] sm:$0xff] }
  0x1c   :  { %3475 = vmatprep.subr.mxu1 %v409_v4 }
  0x1d   :  { %3124 = vmatmul.mubr.msk.bf16.vlgmr.msra.gmra.mxu0 %vm112_vm2, %v3626_v15  ;;  %3476 = vmatpush3.msra.mxu1 %v393_v6  ;;  %v404_v15 = vld [vmem:[%s5360_s5 + $0x198] sm:$0xff] }
  0x1e   :  { %230 = vmatprep.mubr.bf16.mxu0 %v4088_v1  ;;  %3418 = vmatpush3.msra.mxu0 %v368_v23 }
  0x1f   :  { %3419 = vmatprep.subr.mxu0 %v383_v24  ;;  %3477 = vmatprep.subr.mxu1 %v408_v7 }
  0x20   :  { %3420 = vmatpush3.msra.mxu0 %v367_v25  ;;  %3478 = vmatpush3.msra.mxu1 %v392_v8 }
  0x21   :  { %3421 = vmatprep.subr.mxu0 %v382_v26  ;;  %3479 = vmatprep.subr.mxu1 %v407_v9 }
  0x22   :  { %3422 = vmatpush3.msra.mxu0 %v366_v27  ;;  %3480 = vmatpush3.msra.mxu1 %v391_v10 }
  0x23   :  { %3423 = vmatprep.subr.mxu0 %v381_v28  ;;  %3481 = vmatprep.subr.mxu1 %v406_v11 }
  0x24   :  { %3424 = vmatpush3.msra.mxu0 %v365_v29  ;;  %3482 = vmatpush3.msra.mxu1 %v390_v12 }
  0x25   :  { %3125 = vmatmul.mubr.msk.bf16.gmra.mxu0 %vm112_vm2, %v3630_v21  ;;  %3425 = vmatprep.subr.mxu0 %v380_v30  ;;  %v401_v21 = vld [vmem:[%s5360_s5 + $0x180] sm:$0xff] }
  0x26   :  { %3426 = vmatpush3.msra.mxu0 %v364_v31  ;;  %3483 = vmatprep.subr.mxu1 %v405_v13 }
  0x27   :  { %3427 = vmatprep.subr.mxu0 %v379_v32  ;;  %3484 = vmatpush3.msra.mxu1 %v389_v14 }
  0x28   :  { %3428 = vmatpush3.msra.mxu0 %v363_v33  ;;  %3485 = vmatprep.subr.mxu1 %v404_v15 }
  0x29   :  { %3429 = vmatprep.subr.mxu0 %v378_v34  ;;  %3486 = vmatpush3.msra.mxu1 %v388_v16 }
  0x2a   :  { %3430 = vmatpush3.msra.mxu0 %v362_v35  ;;  %3487 = vmatprep.subr.mxu1 %v403_v17 }
  0x2b   :  { %3431 = vmatprep.subr.mxu0 %v377_v36  ;;  %3488 = vmatpush3.msra.mxu1 %v387_v18 }
  0x2c   :  { %3432 = vmatpush3.msra.mxu0 %v361_v37  ;;  %3489 = vmatprep.subr.mxu1 %v402_v19 }
  0x2d   :  { %3433 = vmatprep.subr.mxu0 %v376_v38  ;;  %3490 = vmatpush3.msra.mxu1 %v386_v20 }
  0x2e   :  { %3434 = vmatpush3.msra.mxu0 %v360_v40  ;;  %3491 = vmatprep.subr.mxu1 %v401_v21 }
  0x2f   :  { %3435 = vmatprep.subr.mxu0 %v375_v42  ;;  %3492 = vmatpush3.msra.mxu1 %v385_v22 }
  0x30   :  { %3436 = vmatpush3.msra.mxu0 %v359_v44 }
  0x31   :  { %3437 = vmatprep.subr.mxu0 %v374_v46 }
  0x32   :  { %3438 = vmatpush3.msra.mxu0 %v358_v48 }
  0x33   :  { %3439 = vmatprep.subr.mxu0 %v373_v50 }
  0x34   :  { %3440 = vmatpush3.msra.mxu0 %v357_v52 }
  0x35   :  { %3441 = vmatprep.subr.mxu0 %v372_v54 }
  0x36   :  { %3442 = vmatpush3.msra.mxu0 %v356_v56 }
  0x37   :  { %3443 = vmatprep.subr.mxu0 %v371_v58 }
  0x38   :  { %3444 = vmatpush3.msra.mxu0 %v355_v60 }
  0x39   :  { %3445 = vmatprep.subr.mxu0 %v370_v62 }
  0x3a   :  { %3446 = vmatpush3.msra.mxu0 %v354_v0 }
  0x3b   :  { %3447 = vmatprep.subr.mxu0 %v369_v3 }
  0x3c   :  { %3448 = vmatpush3.msra.mxu0 %v353_v5 }
  0x80   :  { %v49_v23 = vpop.permute.xlu0 %48 }
  0x81   :  { %v59_v31 = vpop.permute.xlu1 %58 }
  0x84   :  { %v54_v27 = vpop.permute.xlu0 %53 }
  0x85   :  { %v64_v41 = vpop.permute.xlu1 %63 }
  0xcd   :  { %v169_v24 = vpop.f32.mrf.mxu0 }
  0xce   :  { %v4379_v25 = vadd.f32 %v169_v24, %v49_v23 }
  0xcf   :  { %v171_v26 = vpop.f32.mrf.mxu0 }
  0xd0   :  { %v3126_v28 = vmul.f32 -1.442695, %v4379_v25  ;;  %v4382_v29 = vadd.f32 %v171_v26, %v49_v23 }
  0xd1   :  { %v173_v30 = vpop.f32.mrf.mxu0 }
  0xd2   :  { %3984 = vpow2.f32 %v3126_v28  ;;  %v3127_v32 = vmul.f32 -1.442695, %v4382_v29  ;;  %v4385_v33 = vadd.f32 %v173_v30, %v54_v27 }
  0xd3   :  { %v175_v34 = vpop.f32.mrf.mxu0 }
  0xd4   :  { %3986 = vpow2.f32 %v3127_v32  ;;  %v3130_v35 = vmul.f32 -1.442695, %v4385_v33  ;;  %v4388_v36 = vadd.f32 %v175_v34, %v54_v27 }
  0xd5   :  { %v179_v37 = vpop.f32.mrf.mxu0 }
  0xd6   :  { %3988 = vpow2.f32 %v3130_v35  ;;  %v3131_v38 = vmul.f32 -1.442695, %v4388_v36  ;;  %v4391_v39 = vadd.f32 %v179_v37, %v59_v31 }
  0xd7   :  { %v181_v40 = vpop.f32.mrf.mxu0 }
  0xd8   :  { %3990 = vpow2.f32 %v3131_v38  ;;  %v3134_v42 = vmul.f32 -1.442695, %v4391_v39  ;;  %v4394_v43 = vadd.f32 %v181_v40, %v59_v31 }
  0xd9   :  { %v183_v44 = vpop.f32.mrf.mxu0 }
  0xda   :  { %3992 = vpow2.f32 %v3134_v42  ;;  %v3135_v45 = vmul.f32 -1.442695, %v4394_v43  ;;  %v4397_v46 = vadd.f32 %v183_v44, %v64_v41 }
  0xdb   :  { %v185_v47 = vpop.f32.mrf.mxu0 }
  0xdc   :  { %3994 = vpow2.f32 %v3135_v45  ;;  %v3138_v48 = vmul.f32 -1.442695, %v4397_v46  ;;  %v4400_v49 = vadd.f32 %v185_v47, %v64_v41 }
  0xdd   :  { %v222_v50 = vpop.f32.mrf.mxu0 }
  0xde   :  { %3996 = vpow2.f32 %v3138_v48  ;;  %v3139_v51 = vmul.f32 -1.442695, %v4400_v49  ;;  %v4403_v52 = vadd.f32 %v222_v50, %v49_v23 }
  0xdf   :  { %v3985_v53 = vpop.eup %3984  ;;  %v224_v54 = vpop.f32.mrf.mxu0 }
  0xe0   :  { %v289_v55 = vadd.f32 1.0, %v3985_v53  ;;  %3998 = vpow2.f32 %v3139_v51  ;;  %v3128_v56 = vmul.f32 -1.442695, %v4403_v52  ;;  %v4406_v57 = vadd.f32 %v224_v54, %v49_v23 }
  0xe1   :  { %v3987_v58 = vpop.eup %3986  ;;  %v226_v59 = vpop.f32.mrf.mxu0 }
  0xe2   :  { %4000 = vrcp.f32 %v289_v55  ;;  %v290_v60 = vadd.f32 1.0, %v3987_v58  ;;  %v3129_v61 = vmul.f32 -1.442695, %v4406_v57  ;;  %v4409_v62 = vadd.f32 %v226_v59, %v54_v27 }
  0xe3   :  { %v3989_v63 = vpop.eup %3988  ;;  %4002 = vpow2.f32 %v3128_v56  ;;  %v228_v0 = vpop.f32.mrf.mxu0 }
  0xe4   :  { %4004 = vrcp.f32 %v290_v60  ;;  %v293_v2 = vadd.f32 1.0, %v3989_v63  ;;  %v3132_v3 = vmul.f32 -1.442695, %v4409_v62  ;;  %v4412_v4 = vadd.f32 %v228_v0, %v54_v27 }
  0xe5   :  { %v3991_v5 = vpop.eup %3990  ;;  %4006 = vpow2.f32 %v3129_v61  ;;  %v232_v6 = vpop.f32.mrf.mxu0 }
  0xe6   :  { %4008 = vrcp.f32 %v293_v2  ;;  %v294_v7 = vadd.f32 1.0, %v3991_v5  ;;  %v3133_v8 = vmul.f32 -1.442695, %v4412_v4  ;;  %v4415_v9 = vadd.f32 %v232_v6, %v59_v31 }
  0xe7   :  { %v3993_v10 = vpop.eup %3992  ;;  %4010 = vpow2.f32 %v3132_v3  ;;  %v234_v11 = vpop.f32.mrf.mxu0 }
  0xe8   :  { %4012 = vrcp.f32 %v294_v7  ;;  %v297_v12 = vadd.f32 1.0, %v3993_v10  ;;  %v3136_v13 = vmul.f32 -1.442695, %v4415_v9  ;;  %v4418_v14 = vadd.f32 %v234_v11, %v59_v31 }
  0xe9   :  { %v3995_v15 = vpop.eup %3994  ;;  %4014 = vpow2.f32 %v3133_v8  ;;  %v236_v16 = vpop.f32.mrf.mxu0 }
  0xea   :  { %4016 = vrcp.f32 %v297_v12  ;;  %v298_v17 = vadd.f32 1.0, %v3995_v15  ;;  %v3137_v18 = vmul.f32 -1.442695, %v4418_v14  ;;  %v4421_v19 = vadd.f32 %v236_v16, %v64_v41 }
  0xeb   :  { %v3997_v20 = vpop.eup %3996  ;;  %4018 = vpow2.f32 %v3136_v13  ;;  %v238_v21 = vpop.f32.mrf.mxu0 }
  0xec   :  { %4020 = vrcp.f32 %v298_v17  ;;  %v301_v22 = vadd.f32 1.0, %v3997_v20  ;;  %v3140_v23 = vmul.f32 -1.442695, %v4421_v19  ;;  %v4424_v24 = vadd.f32 %v238_v21, %v64_v41  ;;  %v3640_v17 = vld [vmem:[%s5361_s3 + $0x58] ss:$40 sps:$4 sm:$0xff]  }
  0xed   :  { %v3999_v26 = vpop.eup %3998  ;;  %4022 = vpow2.f32 %v3137_v18  ;;  %v3642_v18 = vld [vmem:[%s5361_s3 + $0x5c] ss:$40 sps:$4 sm:$0xff]   ;;  %v3645_v20 = vld [vmem:[%s5361_s3 + $0xc] ss:$40 sps:$4 sm:$0xff]  }
  0xee   :  { %4024 = vrcp.f32 %v301_v22  ;;  %v302_v27 = vadd.f32 1.0, %v3999_v26  ;;  %v3141_v28 = vmul.f32 -1.442695, %v4424_v24  ;;  %851 = vmatprep.subr.bf16.mxu1 %v3642_v18  ;;  %v3693_v18 = vld [vmem:[%s5362_s6 + $0x1cc] ss:$12 sps:$4 sm:$0xff]  }
  0xef   :  { %v4001_v30 = vpop.eup %4000  ;;  %4026 = vpow2.f32 %v3140_v23 }
  0xf0   :  { %v4003_v31 = vpop.eup %4002  ;;  %4028 = vrcp.f32 %v302_v27  ;;  %v337_v40 = vmul.f32 %v4001_v30, %v4379_v25 }
  0xf1   :  { %v4005_v32 = vpop.eup %4004  ;;  %v291_v34 = vadd.f32 1.0, %v4003_v31  ;;  %4030 = vpow2.f32 %v3141_v28 }
  0xf2   :  { %v4007_v35 = vpop.eup %4006  ;;  %v338_v37 = vmul.f32 %v4005_v32, %v4382_v29 }
  0xf3   :  { %v4009_v38 = vpop.eup %4008  ;;  %v292_v41 = vadd.f32 1.0, %v4007_v35  ;;  %4032 = vrcp.f32 %v291_v34  ;;  %v3648_v35 = vld [vmem:[%s5361_s3 + $0x64] ss:$40 sps:$4 sm:$0xff]  }
  0xf4   :  { %v4011_v42 = vpop.eup %4010  ;;  %481 = vmatprep.mubr.f32.mxu0 %v338_v37  ;;  %v341_v51 = vmul.f32 %v4009_v38, %v4385_v33  ;;  %v3651_v37 = vld [vmem:[%s5361_s3 + $0x6c] ss:$40 sps:$4 sm:$0xff]  }
  0xf5   :  { %v4013_v44 = vpop.eup %4012  ;;  %4034 = vrcp.f32 %v292_v41  ;;  %v295_v45 = vadd.f32 1.0, %v4011_v42  ;;  %482 = vmatmul.mubr.f32.vlgmr.msra.gmra.mxu0 %v337_v40 }
  0xf6   :  { %v4015_v47 = vpop.eup %4014  ;;  %v342_v48 = vmul.f32 %v4013_v44, %v4388_v36 }
  0xf7   :  { %v4017_v50 = vpop.eup %4016  ;;  %v296_v53 = vadd.f32 1.0, %v4015_v47  ;;  %4036 = vrcp.f32 %v295_v45 }
  0xf8   :  { %v4019_v54 = vpop.eup %4018  ;;  %486 = vmatprep.mubr.f32.mxu0 %v342_v48  ;;  %v345_v59 = vmul.f32 %v4017_v50, %v4391_v39 }
  0xf9   :  { %v4021_v29 = vpop.eup %4020  ;;  %4038 = vrcp.f32 %v296_v53  ;;  %v299_v25 = vadd.f32 1.0, %v4019_v54  ;;  %487 = vmatmul.mubr.f32.gmra.mxu0 %v341_v51 }
  0xfa   :  { %v4023_v55 = vpop.eup %4022  ;;  %v346_v56 = vmul.f32 %v4021_v29, %v4394_v43 }
  0xfb   :  { %v4025_v58 = vpop.eup %4024  ;;  %v300_v60 = vadd.f32 1.0, %v4023_v55  ;;  %4040 = vrcp.f32 %v299_v25 }
  0xfc   :  { %v4027_v61 = vpop.eup %4026  ;;  %491 = vmatprep.mubr.f32.mxu0 %v346_v56  ;;  %v349_v2 = vmul.f32 %v4025_v58, %v4397_v46 }
  0xfd   :  { %v4029_v36 = vpop.eup %4028  ;;  %4042 = vrcp.f32 %v300_v60  ;;  %v303_v33 = vadd.f32 1.0, %v4027_v61  ;;  %492 = vmatmul.mubr.f32.gmra.mxu0 %v345_v59  ;;  %v3646_v59 = vld [vmem:[%s5361_s3 + $0x60] ss:$40 sps:$4 sm:$0xff]   ;;  %v3654_v61 = vld [vmem:[%s5361_s3 + $0x14] ss:$40 sps:$4 sm:$0xff]  }
  0xfe   :  { %v4031_v63 = vpop.eup %4030  ;;  %v350_v0 = vmul.f32 %v4029_v36, %v4400_v49  ;;  %v3649_v60 = vld [vmem:[%s5361_s3 + $0x68] ss:$40 sps:$4 sm:$0xff]   ;;  %v3657_v36 = vld [vmem:[%s5361_s3 + $0x1c] ss:$40 sps:$4 sm:$0xff]  }
  0xff   :  { %v304_v3 = vadd.f32 1.0, %v4031_v63  ;;  %4044 = vrcp.f32 %v303_v33 }
 0x100   :  { %496 = vmatprep.mubr.f32.mxu0 %v350_v0  ;;  %v4033_v43 = vpop.eup %4032  ;;  %v3652_v0 = vld [vmem:[%s5361_s3 + $0x10] ss:$40 sps:$4 sm:$0xff]  }
 0x101   :  { %4046 = vrcp.f32 %v304_v3  ;;  %497 = vmatmul.mubr.f32.gmra.mxu0 %v349_v2  ;;  %v339_v6 = vmul.f32 %v4033_v43, %v4403_v52  ;;  %v3655_v2 = vld [vmem:[%s5361_s3 + $0x18] ss:$40 sps:$4 sm:$0xff]   ;;  %v3660_v3 = vld [vmem:[%s5361_s3 + $0x74] ss:$40 sps:$4 sm:$0xff]  }
 0x102   :  { %v4035_v39 = vpop.eup %4034  ;;  %830 = vmatprep.mubr.bf16.mxu0 %v4088_v1  ;;  %v3666_v43 = vld [vmem:[%s5362_s6 + $0xac] ss:$12 sps:$4 sm:$0xff]  }
 0x103   :  { %v340_v5 = vmul.f32 %v4035_v39, %v4406_v57  ;;  %v3658_v39 = vld [vmem:[%s5361_s3 + $0x70] ss:$40 sps:$4 sm:$0xff]  }
 0x104   :  { %v4037_v7 = vpop.eup %4036 }
 0x105   :  { %566 = vmatprep.mubr.f32.mxu1 %v340_v5  ;;  %v343_v46 = vmul.f32 %v4037_v7, %v4409_v62  ;;  %v3634_v62 = vld [vmem:[%s5361_s3 + $0x50] ss:$40 sps:$4 sm:$0xff]   ;;  %v3663_v5 = vld [vmem:[%s5361_s3 + $0x24] ss:$40 sps:$4 sm:$0xff]   ;;  %v3672_v7 = vld [vmem:[%s5362_s6 + $0x94] ss:$12 sps:$4 sm:$0xff]  }
 0x106   :  { %v4039_v8 = vpop.eup %4038  ;;  %567 = vmatmul.mubr.f32.vlgmr.msra.gmra.mxu1 %v339_v6  ;;  %v3664_v6 = vld [vmem:[%s5362_s6 + $0xa8] ss:$12 sps:$4 sm:$0xff]  }
 0x107   :  { %v344_v49 = vmul.f32 %v4039_v8, %v4412_v4  ;;  %v3636_v4 = vld [vmem:[%s5361_s3 + $0x54] ss:$40 sps:$4 sm:$0xff]   ;;  %852 = vmatpush1.bf16.msra.mxu1 %v3640_v17  ;;  %v3661_v8 = vld [vmem:[%s5361_s3 + $0x20] ss:$40 sps:$4 sm:$0xff]  }
 0x108   :  { %v4041_v10 = vpop.eup %4040  ;;  %810 = vmatprep.subr.bf16.mxu0 %v3636_v4  ;;  %853 = vmatprep.subr.bf16.mxu1 %v3645_v20  ;;  %v3687_v4 = vld [vmem:[%s5362_s6 + $0x1e4] ss:$12 sps:$4 sm:$0xff]   ;;  %v3685_v17 = vld [vmem:[%s5362_s6 + $0x1e0] ss:$12 sps:$4 sm:$0xff]   ;;  %v3691_v20 = vld [vmem:[%s5362_s6 + $0x1c8] ss:$12 sps:$4 sm:$0xff]  }
 0x109   :  { %571 = vmatprep.mubr.f32.mxu1 %v344_v49  ;;  %v347_v13 = vmul.f32 %v4041_v10, %v4415_v9  ;;  %v3637_v9 = vld [vmem:[%s5361_s3] ss:$40 sps:$4 sm:$0xff]   ;;  %811 = vmatpush1.bf16.msra.mxu0 %v3634_v62  ;;  %v3669_v49 = vld [vmem:[%s5362_s6 + $0x22c] ss:$12 sps:$4 sm:$0xff]  }
 0x10a   :  { %v4043_v11 = vpop.eup %4042  ;;  %572 = vmatmul.mubr.f32.gmra.mxu1 %v343_v46  ;;  %v3670_v46 = vld [vmem:[%s5362_s6 + $0x90] ss:$12 sps:$4 sm:$0xff]   ;;  %v3679_v62 = vld [vmem:[%s5362_s6 + $0x1f8] ss:$12 sps:$4 sm:$0xff]  }
 0x10b   :  { %v348_v12 = vmul.f32 %v4043_v11, %v4418_v14  ;;  %v3639_v14 = vld [vmem:[%s5361_s3 + $0x4] ss:$40 sps:$4 sm:$0xff]   ;;  %v3678_v10 = vld [vmem:[%s5362_s6 + $0x7c] ss:$12 sps:$4 sm:$0xff]   ;;  %v3675_v11 = vld [vmem:[%s5362_s6 + $0x214] ss:$12 sps:$4 sm:$0xff]  }
 0x10c   :  { %v4045_v15 = vpop.eup %4044  ;;  %812 = vmatprep.subr.bf16.mxu0 %v3639_v14  ;;  %v3696_v14 = vld [vmem:[%s5362_s6 + $0x34] ss:$12 sps:$4 sm:$0xff]  }
 0x10d   :  { %576 = vmatprep.mubr.f32.mxu1 %v348_v12  ;;  %v351_v16 = vmul.f32 %v4045_v15, %v4421_v19  ;;  %v3643_v19 = vld [vmem:[%s5361_s3 + $0x8] ss:$40 sps:$4 sm:$0xff]   ;;  %813 = vmatpush1.bf16.msra.mxu0 %v3637_v9  ;;  %v3676_v12 = vld [vmem:[%s5362_s6 + $0x78] ss:$12 sps:$4 sm:$0xff]  }
 0x10e   :  { %v4047_v57 = vpop.eup %4046  ;;  %577 = vmatmul.mubr.f32.gmra.mxu1 %v347_v13  ;;  %892 = vmatprep.subr.bf16.mxu0 %v3648_v35  ;;  %v3684_v13 = vld [vmem:[%s5362_s6 + $0x64] ss:$12 sps:$4 sm:$0xff]   ;;  %v3688_v9 = vld [vmem:[%s5362_s6 + $0x48] ss:$12 sps:$4 sm:$0xff]   ;;  %v3717_v35 = vld [vmem:[%s5362_s6 + $0x2ec] ss:$12 sps:$4 sm:$0xff]  }
 0x10f   :  { %v352_v52 = vmul.f32 %v4047_v57, %v4424_v24  ;;  %854 = vmatpush1.bf16.msra.mxu1 %v3643_v19  ;;  %v3673_v15 = vld [vmem:[%s5362_s6 + $0x210] ss:$12 sps:$4 sm:$0xff]  }
 0x110   :  { %933 = vmatprep.subr.bf16.mxu1 %v3651_v37  ;;  %v3681_v57 = vld [vmem:[%s5362_s6 + $0x1fc] ss:$12 sps:$4 sm:$0xff]  }
 0x111   :  { %581 = vmatprep.mubr.f32.mxu1 %v352_v52  ;;  %v3682_v52 = vld [vmem:[%s5362_s6 + $0x60] ss:$12 sps:$4 sm:$0xff]   ;;  %v3694_v19 = vld [vmem:[%s5362_s6 + $0x30] ss:$12 sps:$4 sm:$0xff]   ;;  %v3712_v37 = vld [vmem:[%s5362_s6 + $0x168] ss:$12 sps:$4 sm:$0xff]  }
 0x112   :  { %582 = vmatmul.mubr.f32.gmra.mxu1 %v351_v16  ;;  %v3690_v16 = vld [vmem:[%s5362_s6 + $0x4c] ss:$12 sps:$4 sm:$0xff]  }
 0x113   :  { %871 = vmatprep.mubr.bf16.mxu1 %v4088_v1 }
 0x1b5   :  { %v3449_v21 = vpop.f32.mrf.mxu0 }
 0x1b7   :  { %v3450_v22 = vpop.f32.mrf.mxu0 }
 0x1b8   :  { %v3451_v30 = vadd.f32 %v3450_v22, %v3449_v21  ;;  %v3699_v21 = vld [vmem:[%s5362_s6 + $0x1b4] ss:$12 sps:$4 sm:$0xff]   ;;  %v3697_v22 = vld [vmem:[%s5362_s6 + $0x1b0] ss:$12 sps:$4 sm:$0xff]  }
 0x1b9   :  { %v3452_v23 = vpop.f32.mrf.mxu0 }
 0x1bb   :  { %v3453_v24 = vpop.f32.mrf.mxu0 }
 0x1bc   :  { %v3454_v41 = vadd.f32 %v3453_v24, %v3452_v23  ;;  %v3702_v23 = vld [vmem:[%s5362_s6 + $0x1c] ss:$12 sps:$4 sm:$0xff]  }
 0x1bd   :  { %v3455_v26 = vpop.f32.mrf.mxu0  ;;  %v3705_v24 = vld [vmem:[%s5362_s6 + $0x19c] ss:$12 sps:$4 sm:$0xff]  }
 0x1bf   :  { %v3456_v32 = vpop.f32.mrf.mxu0 }
 0x1c0   :  { %v3457_v50 = vadd.f32 %v3456_v32, %v3455_v26  ;;  %v3700_v26 = vld [vmem:[%s5362_s6 + $0x18] ss:$12 sps:$4 sm:$0xff]   ;;  %v3709_v32 = vld [vmem:[%s5362_s6 + $0x180] ss:$12 sps:$4 sm:$0xff]  }
 0x1c1   :  { %v3458_v44 = vpop.f32.mrf.mxu0 }
 0x1c3   :  { %v3459_v53 = vpop.f32.mrf.mxu0 }
 0x1c4   :  { %v3460_v55 = vadd.f32 %v3459_v53, %v3458_v44  ;;  %v3721_v44 = vld [vmem:[%s5362_s6 + $0x2d0] ss:$12 sps:$4 sm:$0xff]  }
 0x1c5   :  { %v3735_v53 = vld [vmem:[%s5362_s6 + $0x2a4] ss:$12 sps:$4 sm:$0xff]  }
 0x1c6   :  { %v3493_v27 = vpop.f32.mrf.mxu1 }
 0x1c8   :  { %v3494_v28 = vpop.f32.mrf.mxu1 }
 0x1c9   :  { %v3495_v31 = vadd.f32 %v3494_v28, %v3493_v27  ;;  %v3703_v27 = vld [vmem:[%s5362_s6 + $0x198] ss:$12 sps:$4 sm:$0xff]  }
 0x1ca   :  { %v3496_v34 = vpop.f32.mrf.mxu1  ;;  %v3708_v28 = vld [vmem:[%s5362_s6 + $0x4] ss:$12 sps:$4 sm:$0xff]  }
 0x1cb   :  { %v569_v38 = vadd.f32 %v3495_v31, %v3451_v30  ;;  %v3711_v30 = vld [vmem:[%s5362_s6 + $0x184] ss:$12 sps:$4 sm:$0xff]   ;;  %v3706_v31 = vld [vmem:[%s5362_s6] ss:$12 sps:$4 sm:$0xff]  }
 0x1cc   :  { %v3497_v40 = vpop.f32.mrf.mxu1 }
 0x1cd   :  { %v3498_v42 = vadd.f32 %v3497_v40, %v3496_v34  ;;  %587 = vxpose.xlu0.b32.start [1/4] (short) (narrow) %v569_v38, 8  ;;  %v3714_v34 = vld [vmem:[%s5362_s6 + $0x16c] ss:$12 sps:$4 sm:$0xff]   ;;  %v3715_v38 = vld [vmem:[%s5362_s6 + $0x2e8] ss:$12 sps:$4 sm:$0xff]  }
 0x1ce   :  { %v3499_v45 = vpop.f32.mrf.mxu1  ;;  %v3720_v40 = vld [vmem:[%s5362_s6 + $0x154] ss:$12 sps:$4 sm:$0xff]  }
 0x1cf   :  { %v574_v47 = vadd.f32 %v3498_v42, %v3454_v41  ;;  %v3723_v41 = vld [vmem:[%s5362_s6 + $0x2d4] ss:$12 sps:$4 sm:$0xff]   ;;  %v3718_v42 = vld [vmem:[%s5362_s6 + $0x150] ss:$12 sps:$4 sm:$0xff]  }
 0x1d0   :  { %v3500_v48 = vpop.f32.mrf.mxu1 }
 0x1d1   :  { %v3501_v51 = vadd.f32 %v3500_v48, %v3499_v45  ;;  %588 = vxpose.xlu0.b32.cont [2/4] (short) (narrow) %v574_v47, 8  ;;  %v3726_v45 = vld [vmem:[%s5362_s6 + $0x13c] ss:$12 sps:$4 sm:$0xff]   ;;  %v3724_v48 = vld [vmem:[%s5362_s6 + $0x138] ss:$12 sps:$4 sm:$0xff]  }
 0x1d2   :  { %v3502_v54 = vpop.f32.mrf.mxu1  ;;  %v3729_v47 = vld [vmem:[%s5362_s6 + $0x2bc] ss:$12 sps:$4 sm:$0xff]  }
 0x1d3   :  { %v579_v29 = vadd.f32 %v3501_v51, %v3457_v50  ;;  %v3727_v50 = vld [vmem:[%s5362_s6 + $0x2b8] ss:$12 sps:$4 sm:$0xff]  }
 0x1d4   :  { %v3503_v25 = vpop.f32.mrf.mxu1  ;;  %v3732_v51 = vld [vmem:[%s5362_s6 + $0x124] ss:$12 sps:$4 sm:$0xff]  }
 0x1d5   :  { %v3504_v56 = vadd.f32 %v3503_v25, %v3502_v54  ;;  %589 = vxpose.xlu0.b32.cont [3/4] (short) (narrow) %v579_v29, 8  ;;  %v3730_v54 = vld [vmem:[%s5362_s6 + $0x120] ss:$12 sps:$4 sm:$0xff]  }
 0x1d6   :  { %v3733_v29 = vld [vmem:[%s5362_s6 + $0x2a0] ss:$12 sps:$4 sm:$0xff]  }
 0x1d7   :  { %v584_v58 = vadd.f32 %v3504_v56, %v3460_v55  ;;  %v3738_v25 = vld [vmem:[%s5362_s6 + $0x10c] ss:$12 sps:$4 sm:$0xff]   ;;  %v3736_v56 = vld [vmem:[%s5362_s6 + $0x108] ss:$12 sps:$4 sm:$0xff]  }
 0x1d8   :  { %v3741_v55 = vld [vmem:[%s5362_s6 + $0x28c] ss:$12 sps:$4 sm:$0xff]  }
 0x1d9   :  { %590 = vxpose.xlu0.b32.end [4/4] (short) (narrow) %v584_v58, 8  ;;  %v3739_v58 = vld [vmem:[%s5362_s6 + $0x288] ss:$12 sps:$4 sm:$0xff]  }
 0x249   :  { %v603_v33 = vpop.trf.xlu0 }
 0x24a   :  { %v619_v63 = vpack.c.bf16 %v603_v33, %v603_v33  ;;  %v3750_v33 = vld [vmem:[%s5362_s6 + $0xdc] ss:$12 sps:$4 sm:$0xff]  }
 0x24c   :  { %3162 = vmatmul.mubr.msk.bf16.vlgmr.msra.gmra.mxu0 %vm794_vm3, %v619_v63  ;;  %3163 = vmatmul.mubr.msk.bf16.vlgmr.msra.gmra.mxu1 %vm794_vm3, %v619_v63 }
 0x24d   :  { %893 = vmatpush1.bf16.msra.mxu0 %v3646_v59  ;;  %934 = vmatpush1.bf16.msra.mxu1 %v3649_v60  ;;  %v3744_v59 = vld [vmem:[%s5362_s6 + $0xf4] ss:$12 sps:$4 sm:$0xff]  }
 0x24e   :  { %894 = vmatprep.subr.bf16.mxu0 %v3654_v61  ;;  %935 = vmatprep.subr.bf16.mxu1 %v3657_v36  ;;  %v3747_v60 = vld [vmem:[%s5362_s6 + $0x274] ss:$12 sps:$4 sm:$0xff]   ;;  %v3742_v61 = vld [vmem:[%s5362_s6 + $0xf0] ss:$12 sps:$4 sm:$0xff]  }
 0x24f   :  { %912 = vmatprep.mubr.bf16.mxu0 %v4088_v1  ;;  %953 = vmatprep.mubr.bf16.mxu1 %v4088_v1  ;;  %v3745_v36 = vld [vmem:[%s5362_s6 + $0x270] ss:$12 sps:$4 sm:$0xff]  }
 0x251   :  { %895 = vmatpush1.bf16.msra.mxu0 %v3652_v0  ;;  %936 = vmatpush1.bf16.msra.mxu1 %v3655_v2  ;;  %v3748_v0 = vld [vmem:[%s5362_s6 + $0xd8] ss:$12 sps:$4 sm:$0xff]  }
 0x252   :  { %974 = vmatprep.subr.bf16.mxu0 %v3660_v3  ;;  %2700 = vmatprep.subr.bf16.mxu1 %v3666_v43  ;;  %v3751_v2 = vld [vmem:[%s5362_s6 + $0x258] ss:$12 sps:$4 sm:$0xff]  }
 0x253   :  { %v3756_v3 = vld [vmem:[%s5362_s6 + $0xc4] ss:$12 sps:$4 sm:$0xff]  }
 0x254   :  { %3164 = vmatmul.mubr.msk.bf16.vlgmr.msra.gmra.mxu0 %vm794_vm3, %v619_v63  ;;  %3165 = vmatmul.mubr.msk.bf16.vlgmr.msra.gmra.mxu1 %vm794_vm3, %v619_v63  ;;  %v3759_v43 = vld [vmem:[%s5362_s6 + $0x244] ss:$12 sps:$4 sm:$0xff]  }
 0x255   :  { %975 = vmatpush1.bf16.msra.mxu0 %v3658_v39  ;;  %994 = vmatprep.mubr.bf16.mxu0 %v4088_v1  ;;  %v3667_v1 = vld [vmem:[%s5362_s6 + $0x228] ss:$12 sps:$4 sm:$0xff]   ;;  %v3754_v39 = vld [vmem:[%s5362_s6 + $0xc0] ss:$12 sps:$4 sm:$0xff]  }
 0x256   :  { %976 = vmatprep.subr.bf16.mxu0 %v3663_v5  ;;  %2701 = vmatpush1.bf16.msra.mxu1 %v3664_v6  ;;  %v3757_v5 = vld [vmem:[%s5362_s6 + $0x240] ss:$12 sps:$4 sm:$0xff]  }
 0x257   :  { %2702 = vmatprep.subr.bf16.mxu1 %v3672_v7  ;;  %v3762_v6 = vld [vmem:[%s5362_s6 + $0x3ac] ss:$12 sps:$4 sm:$0xff]  }
 0x258   :  { %v3765_v7 = vld [vmem:[%s5362_s6 + $0x52c] ss:$12 sps:$4 sm:$0xff]  }
 0x259   :  { %977 = vmatpush1.bf16.msra.mxu0 %v3661_v8  ;;  %v644_v8 = vlaneseq }
 0x25a   :  { %2741 = vmatprep.subr.bf16.mxu0 %v3669_v49  ;;  %2703 = vmatpush1.bf16.msra.mxu1 %v3670_v46 }
 0x25b   :  { %2704 = vmatprep.subr.bf16.mxu1 %v3678_v10  ;;  %v4711_v49 = vshrl.u32 %v644_v8, 7 }
 0x25c   :  { %3166 = vmatmul.mubr.msk.bf16.vlgmr.msra.gmra.mxu0 %vm794_vm3, %v619_v63  ;;  %v3753_v63 = vld [vmem:[%s5362_s6 + $0x25c] ss:$12 sps:$4 sm:$0xff]  }
 0x25d   :  { %2742 = vmatpush1.bf16.msra.mxu0 %v3667_v1  ;;  %v4714_v46 = vsub.s32 0, %v4711_v49  ;;  %v654_v10 = vsub.s32 2, %v4711_v49  ;;  %v4720_v1 = vld [vmem:[%s5363_s4] sm:$0xff] }
 0x25e   :  { %2743 = vmatprep.subr.bf16.mxu0 %v3675_v11  ;;  %2705 = vmatpush1.bf16.msra.mxu1 %v3676_v12  ;;  %v4723_v11 = vsub.s32 1, %v4711_v49  ;;  %v658_v12 = vsub.s32 3, %v4711_v49 }
 0x25f   :  { %2706 = vmatprep.subr.bf16.mxu1 %v3684_v13  ;;  %v647_v13 = vrot.slane %v4720_v1, %v4714_v46 }
 0x261   :  { %2744 = vmatpush1.bf16.msra.mxu0 %v3673_v15  ;;  %v655_v15 = vrot.slane %v4720_v1, %v654_v10 }
 0x262   :  { %2745 = vmatprep.subr.bf16.mxu0 %v3681_v57  ;;  %2707 = vmatpush1.bf16.msra.mxu1 %v3682_v52  ;;  %v651_v57 = vrot.slane %v4720_v1, %v4723_v11  ;;  %v659_v52 = vrot.slane %v4720_v1, %v658_v12 }
 0x263   :  { %2708 = vmatprep.subr.bf16.mxu1 %v3690_v16 }
 0x265   :  { %2746 = vmatpush1.bf16.msra.mxu0 %v3679_v62 }
 0x266   :  { %2747 = vmatprep.subr.bf16.mxu0 %v3687_v4  ;;  %2709 = vmatpush1.bf16.msra.mxu1 %v3688_v9 }
 0x267   :  { %2710 = vmatprep.subr.bf16.mxu1 %v3696_v14 }
 0x269   :  { %2748 = vmatpush1.bf16.msra.mxu0 %v3685_v17 }
 0x26a   :  { %2749 = vmatprep.subr.bf16.mxu0 %v3693_v18  ;;  %2711 = vmatpush1.bf16.msra.mxu1 %v3694_v19  ;;  %v666_v18 = vsub.s32 5, %v4711_v49  ;;  %v674_v19 = vsub.s32 7, %v4711_v49 }
 0x26b   :  { %2712 = vmatprep.subr.bf16.mxu1 %v3702_v23 }
 0x26d   :  { %2750 = vmatpush1.bf16.msra.mxu0 %v3691_v20 }
 0x26e   :  { %2751 = vmatprep.subr.bf16.mxu0 %v3699_v21  ;;  %2713 = vmatpush1.bf16.msra.mxu1 %v3700_v26 }
 0x26f   :  { %2714 = vmatprep.subr.bf16.mxu1 %v3708_v28 }
 0x271   :  { %2752 = vmatpush1.bf16.msra.mxu0 %v3697_v22 }
 0x272   :  { %2753 = vmatprep.subr.bf16.mxu0 %v3705_v24  ;;  %2715 = vmatpush1.bf16.msra.mxu1 %v3706_v31 }
 0x273   :  { %2716 = vmatprep.subr.bf16.mxu1 %v3714_v34  ;;  %v675_v34 = vrot.slane %v4720_v1, %v674_v19  ;;  %v3769_v19 = vld [vmem:[%s5362_s6 + $0x510] ss:$12 sps:$4 sm:$0xff]  }
 0x275   :  { %2754 = vmatpush1.bf16.msra.mxu0 %v3703_v27 }
 0x276   :  { %2755 = vmatprep.subr.bf16.mxu0 %v3711_v30  ;;  %2717 = vmatpush2.bf16.msra.mxu1 %v3712_v37 }
 0x277   :  { %2718 = vmatprep.subr.bf16.mxu1 %v3720_v40 }
 0x279   :  { %2756 = vmatpush1.bf16.msra.mxu0 %v3709_v32  ;;  %v667_v32 = vrot.slane %v4720_v1, %v666_v18 }
 0x27a   :  { %2757 = vmatprep.subr.bf16.mxu0 %v3717_v35  ;;  %2719 = vmatpush2.bf16.msra.mxu1 %v3718_v42 }
 0x27b   :  { %2720 = vmatprep.subr.bf16.mxu1 %v3726_v45 }
 0x27d   :  { %2758 = vmatpush2.bf16.msra.mxu0 %v3715_v38 }
 0x27e   :  { %2759 = vmatprep.subr.bf16.mxu0 %v3723_v41  ;;  %2721 = vmatpush2.bf16.msra.mxu1 %v3724_v48 }
 0x27f   :  { %2722 = vmatprep.subr.bf16.mxu1 %v3732_v51 }
 0x281   :  { %2760 = vmatpush2.bf16.msra.mxu0 %v3721_v44 }
 0x282   :  { %2761 = vmatprep.subr.bf16.mxu0 %v3729_v47  ;;  %2723 = vmatpush2.bf16.msra.mxu1 %v3730_v54 }
 0x283   :  { %2724 = vmatprep.subr.bf16.mxu1 %v3738_v25 }
 0x285   :  { %2762 = vmatpush2.bf16.msra.mxu0 %v3727_v50 }
 0x286   :  { %2763 = vmatprep.subr.bf16.mxu0 %v3735_v53  ;;  %2725 = vmatpush2.bf16.msra.mxu1 %v3736_v56 }
 0x287   :  { %2726 = vmatprep.subr.bf16.mxu1 %v3744_v59 }
 0x289   :  { %2764 = vmatpush2.bf16.msra.mxu0 %v3733_v29 }
 0x28a   :  { %2765 = vmatprep.subr.bf16.mxu0 %v3741_v55  ;;  %2727 = vmatpush2.bf16.msra.mxu1 %v3742_v61 }
 0x28b   :  { %2728 = vmatprep.subr.bf16.mxu1 %v3750_v33 }
 0x28d   :  { %2766 = vmatpush2.bf16.msra.mxu0 %v3739_v58 }
 0x28e   :  { %2767 = vmatprep.subr.bf16.mxu0 %v3747_v60  ;;  %2729 = vmatpush2.bf16.msra.mxu1 %v3748_v0 }
 0x28f   :  { %2730 = vmatprep.subr.bf16.mxu1 %v3756_v3 }
 0x291   :  { %2768 = vmatpush2.bf16.msra.mxu0 %v3745_v36 }
 0x292   :  { %2769 = vmatprep.subr.bf16.mxu0 %v3753_v63  ;;  %2731 = vmatpush2.bf16.msra.mxu1 %v3754_v39 }
 0x293   :  { %2782 = vmatprep.subr.bf16.mxu1 %v3762_v6 }
 0x295   :  { %2770 = vmatpush2.bf16.msra.mxu0 %v3751_v2 }
 0x296   :  { %2771 = vmatprep.subr.bf16.mxu0 %v3759_v43 }
 0x299   :  { %2772 = vmatpush2.bf16.msra.mxu0 %v3757_v5 }
 0x29a   :  { %2823 = vmatprep.subr.bf16.mxu0 %v3765_v7 }
 0x30c   :  { %v832_v16 = vpop.f32.mrf.mxu0  ;;  %v873_v62 = vpop.f32.mrf.mxu1 }
 0x30d   :  { %v833_v4 = vadd.f32 %v832_v16, %v647_v13  ;;  %v874_v9 = vadd.f32 %v873_v62, %v655_v15  ;;  %v3763_v62 = vld [vmem:[%s5362_s6 + $0x528] ss:$12 sps:$4 sm:$0xff]  }
 0x30e   :  { %v834_v14 = vpop.f32.mrf.mxu0  ;;  %v875_v17 = vpop.f32.mrf.mxu1 }
 0x30f   :  { %v3167_v20 = vmul.f32 -1.442695, %v833_v4  ;;  %v3169_v21 = vmul.f32 -1.442695, %v874_v9  ;;  %v835_v22 = vadd.f32 %v834_v14, %v651_v57  ;;  %v876_v23 = vadd.f32 %v875_v17, %v659_v52  ;;  %v3760_v57 = vld [vmem:[%s5362_s6 + $0x3a8] ss:$12 sps:$4 sm:$0xff]  }
 0x310   :  { %v836_v24 = vpop.f32.mrf.mxu0  ;;  %v877_v26 = vpop.f32.mrf.mxu1  ;;  %v3771_v14 = vld [vmem:[%s5362_s6 + $0x514] ss:$12 sps:$4 sm:$0xff]   ;;  %v3766_v17 = vld [vmem:[%s5362_s6 + $0x390] ss:$12 sps:$4 sm:$0xff]  }
 0x311   :  { %4048 = vpow2.f32 %v3167_v20  ;;  %v3168_v27 = vmul.f32 -1.442695, %v835_v22  ;;  %v3170_v28 = vmul.f32 -1.442695, %v876_v23  ;;  %v3774_v20 = vld [vmem:[%s5362_s6 + $0x37c] ss:$12 sps:$4 sm:$0xff]  }
 0x312   :  { %4050 = vpow2.f32 %v3169_v21  ;;  %v837_v30 = vpop.f32.mrf.mxu0  ;;  %v878_v31 = vpop.f32.mrf.mxu1 }
 0x313   :  { %4052 = vpow2.f32 %v3168_v27  ;;  %v3772_v27 = vld [vmem:[%s5362_s6 + $0x378] ss:$12 sps:$4 sm:$0xff]  }
 0x314   :  { %4054 = vpow2.f32 %v3170_v28  ;;  %v4738_v35 = vpop.f32.mrf.mxu0  ;;  %v4740_v37 = vpop.f32.mrf.mxu1  ;;  %v662_v28 = vsub.s32 4, %v4711_v49  ;;  %v3775_v31 = vld [vmem:[%s5362_s6 + $0x4f8] ss:$12 sps:$4 sm:$0xff]  }
 0x316   :  { %v916_v38 = vpop.f32.mrf.mxu0  ;;  %v957_v40 = vpop.f32.mrf.mxu1 }
 0x317   :  { %v917_v41 = vadd.f32 %v916_v38, %v667_v32  ;;  %v958_v42 = vadd.f32 %v957_v40, %v675_v34  ;;  %v3780_v32 = vld [vmem:[%s5362_s6 + $0x364] ss:$12 sps:$4 sm:$0xff]   ;;  %v670_v34 = vsub.s32 6, %v4711_v49  ;;  %v3778_v40 = vld [vmem:[%s5362_s6 + $0x360] ss:$12 sps:$4 sm:$0xff]  }
 0x318   :  { %v918_v44 = vpop.f32.mrf.mxu0  ;;  %v959_v45 = vpop.f32.mrf.mxu1  ;;  %v3783_v38 = vld [vmem:[%s5362_s6 + $0x4e4] ss:$12 sps:$4 sm:$0xff]  }
 0x319   :  { %v3172_v47 = vmul.f32 -1.442695, %v917_v41  ;;  %v3174_v48 = vmul.f32 -1.442695, %v958_v42  ;;  %v3786_v44 = vld [vmem:[%s5362_s6 + $0x34c] ss:$12 sps:$4 sm:$0xff]   ;;  %v671_v45 = vrot.slane %v4720_v1, %v670_v34 }
 0x31a   :  { %v919_v50 = vpop.f32.mrf.mxu0  ;;  %v960_v51 = vpop.f32.mrf.mxu1  ;;  %v3837_v34 = vld [vmem:[%s5362_s6 + $0x58c] ss:$12 sps:$4 sm:$0xff]  }
 0x31b   :  { %4056 = vpow2.f32 %v3172_v47  ;;  %v4816_v47 = vld [vmem:[%s5363_s4 + $0x8] sm:$0x3] }
 0x31c   :  { %4058 = vpow2.f32 %v3174_v48  ;;  %v4742_v53 = vpop.f32.mrf.mxu0  ;;  %v3789_v48 = vld [vmem:[%s5362_s6 + $0x4cc] ss:$12 sps:$4 sm:$0xff]   ;;  %v683_v50 = vrot.slane %v4816_v47, %v4723_v11  ;;  %v3784_v51 = vld [vmem:[%s5362_s6 + $0x348] ss:$12 sps:$4 sm:$0xff]  }
 0x31e   :  { %v4049_v54 = vpop.eup %4048  ;;  %v4744_v29 = vpop.f32.mrf.mxu0 }
 0x31f   :  { %v4051_v25 = vpop.eup %4050  ;;  %v1033_v55 = vadd.f32 1.0, %v4049_v54  ;;  %v3787_v54 = vld [vmem:[%s5362_s6 + $0x4c8] ss:$12 sps:$4 sm:$0xff]  }
 0x320   :  { %v4053_v56 = vpop.eup %4052  ;;  %v1035_v58 = vadd.f32 1.0, %v4051_v25  ;;  %v1000_v59 = vpop.f32.mrf.mxu0  ;;  %v3792_v25 = vld [vmem:[%s5362_s6 + $0x334] ss:$12 sps:$4 sm:$0xff]  }
 0x321   :  { %v4055_v60 = vpop.eup %4054  ;;  %4060 = vrcp.f32 %v1033_v55  ;;  %v1034_v61 = vadd.f32 1.0, %v4053_v56  ;;  %v4836_v55 = vadd.f32 %v4740_v37, %v671_v45  ;;  %v3795_v56 = vld [vmem:[%s5362_s6 + $0x4b4] ss:$12 sps:$4 sm:$0xff]   ;;  %v3793_v37 = vld [vmem:[%s5362_s6 + $0x4b0] ss:$12 sps:$4 sm:$0xff]  }
 0x322   :  { %4062 = vrcp.f32 %v1035_v58  ;;  %v1036_v36 = vadd.f32 1.0, %v4055_v60  ;;  %v1001_v33 = vpop.f32.mrf.mxu0  ;;  %v3790_v58 = vld [vmem:[%s5362_s6 + $0x330] ss:$12 sps:$4 sm:$0xff]  }
 0x323   :  { %4064 = vrcp.f32 %v1034_v61  ;;  %v3798_v60 = vld [vmem:[%s5362_s6 + $0x31c] ss:$12 sps:$4 sm:$0xff]   ;;  %v3796_v33 = vld [vmem:[%s5362_s6 + $0x318] ss:$12 sps:$4 sm:$0xff]  }
 0x324   :  { %4066 = vrcp.f32 %v1036_v36  ;;  %v3801_v61 = vld [vmem:[%s5362_s6 + $0x49c] ss:$12 sps:$4 sm:$0xff]  }
 0x325   :  { %v3841_v45 = vld [vmem:[%s5362_s6 + $0x570] ss:$12 sps:$4 sm:$0xff]  }
 0x328   :  { %v4057_v63 = vpop.eup %4056 }
 0x329   :  { %v4059_v0 = vpop.eup %4058  ;;  %v1038_v2 = vadd.f32 1.0, %v4057_v63  ;;  %v3799_v63 = vld [vmem:[%s5362_s6 + $0x498] ss:$12 sps:$4 sm:$0xff]  }
 0x32a   :  { %v1040_v3 = vadd.f32 1.0, %v4059_v0  ;;  %v3804_v0 = vld [vmem:[%s5362_s6 + $0x304] ss:$12 sps:$4 sm:$0xff]  }
 0x32b   :  { %4068 = vrcp.f32 %v1038_v2  ;;  %v3807_v2 = vld [vmem:[%s5362_s6 + $0x484] ss:$12 sps:$4 sm:$0xff]  }
 0x32c   :  { %4070 = vrcp.f32 %v1040_v3  ;;  %v3802_v3 = vld [vmem:[%s5362_s6 + $0x300] ss:$12 sps:$4 sm:$0xff]  }
 0x32e   :  { %v4061_v43 = vpop.eup %4060 }
 0x32f   :  { %v4063_v39 = vpop.eup %4062  ;;  %v1063_v6 = vmul.f32 %v4061_v43, %v833_v4  ;;  %v3768_v4 = vld [vmem:[%s5362_s6 + $0x394] ss:$12 sps:$4 sm:$0xff]  }
 0x330   :  { %v4065_v5 = vpop.eup %4064  ;;  %v1065_v8 = vmul.f32 %v4063_v39, %v874_v9  ;;  %v3805_v43 = vld [vmem:[%s5362_s6 + $0x480] ss:$12 sps:$4 sm:$0xff]  }
 0x331   :  { %v4067_v7 = vpop.eup %4066  ;;  %v1064_v12 = vmul.f32 %v4065_v5, %v835_v22  ;;  %v4751_v52 = vpack.c.bf16 %v1063_v6, %v1063_v6  ;;  %v3810_v39 = vld [vmem:[%s5362_s6 + $0x46c] ss:$12 sps:$4 sm:$0xff]   ;;  %v3808_v6 = vld [vmem:[%s5362_s6 + $0x468] ss:$12 sps:$4 sm:$0xff]  }
 0x332   :  { %v1066_v13 = vmul.f32 %v4067_v7, %v876_v23  ;;  %v4761_v9 = vpack.c.bf16 %v1065_v8, %v1065_v8  ;;  %v3777_v23 = vld [vmem:[%s5362_s6 + $0x4fc] ss:$12 sps:$4 sm:$0xff]   ;;  %v3813_v5 = vld [vmem:[%s5362_s6 + $0x5ec] ss:$12 sps:$4 sm:$0xff]   ;;  %v3816_v8 = vld [vmem:[%s5362_s6 + $0x454] ss:$12 sps:$4 sm:$0xff]  }
 0x333   :  { %v4746_v15 = vpack.c.bf16 %v1064_v12, %v1064_v12  ;;  %v3811_v7 = vld [vmem:[%s5362_s6 + $0x5e8] ss:$12 sps:$4 sm:$0xff]  }
 0x334   :  { %v4753_v16 = vpack.c.bf16 %v1066_v13, %v1066_v13  ;;  %v3819_v12 = vld [vmem:[%s5362_s6 + $0x5d4] ss:$12 sps:$4 sm:$0xff]   ;;  %v3814_v13 = vld [vmem:[%s5362_s6 + $0x450] ss:$12 sps:$4 sm:$0xff]  }
 0x335   :  { %2732 = vmatprep.mubr.bf16.mxu1 %v4746_v15 }
 0x336   :  { %2773 = vmatprep.mubr.bf16.mxu0 %v4753_v16  ;;  %2733 = vmatmul.mubr.bf16.vlgmr.msra.gmra.mxu1 %v4751_v52 }
 0x337   :  { %2774 = vmatmul.mubr.bf16.vlgmr.msra.gmra.mxu0 %v4761_v9  ;;  %2783 = vmatpush1.bf16.msra.mxu1 %v3760_v57  ;;  %v3817_v57 = vld [vmem:[%s5362_s6 + $0x5d0] ss:$12 sps:$4 sm:$0xff]  }
 0x338   :  { %v4069_v18 = vpop.eup %4068  ;;  %2824 = vmatpush1.bf16.msra.mxu0 %v3763_v62  ;;  %2784 = vmatprep.subr.bf16.mxu1 %v3768_v4  ;;  %v3822_v62 = vld [vmem:[%s5362_s6 + $0x43c] ss:$12 sps:$4 sm:$0xff]  }
 0x339   :  { %v4071_v21 = vpop.eup %4070  ;;  %v1068_v22 = vmul.f32 %v4069_v18, %v917_v41  ;;  %2825 = vmatprep.subr.bf16.mxu0 %v3771_v14  ;;  %v663_v41 = vrot.slane %v4720_v1, %v662_v28  ;;  %v3825_v14 = vld [vmem:[%s5362_s6 + $0x5bc] ss:$12 sps:$4 sm:$0xff]   ;;  %v3826_v28 = vld [vmem:[%s5362_s6 + $0x420] ss:$12 sps:$4 sm:$0xff]  }
 0x33a   :  { %v1070_v24 = vmul.f32 %v4071_v21, %v958_v42  ;;  %v3781_v42 = vld [vmem:[%s5362_s6 + $0x4e0] ss:$12 sps:$4 sm:$0xff]   ;;  %v3823_v21 = vld [vmem:[%s5362_s6 + $0x5b8] ss:$12 sps:$4 sm:$0xff]  }
 0x33b   :  { %v4782_v26 = vpack.c.bf16 %v1068_v22, %v1068_v22  ;;  %2785 = vmatpush1.bf16.msra.mxu1 %v3766_v17  ;;  %v4827_v1 = vadd.f32 %v4738_v35, %v663_v41  ;;  %v4842_v35 = vadd.f32 %v4744_v29, %v683_v50  ;;  %v3173_v29 = vmul.f32 -1.442695, %v4836_v55  ;;  %v3828_v22 = vld [vmem:[%s5362_s6 + $0x424] ss:$12 sps:$4 sm:$0xff]   ;;  %v3840_v41 = vld [vmem:[%s5362_s6 + $0x3f4] ss:$12 sps:$4 sm:$0xff]  }
 0x33c   :  { %v4788_v30 = vpack.c.bf16 %v1070_v24, %v1070_v24  ;;  %2826 = vmatpush1.bf16.msra.mxu0 %v3769_v19  ;;  %2786 = vmatprep.subr.bf16.mxu1 %v3774_v20  ;;  %v3820_v19 = vld [vmem:[%s5362_s6 + $0x438] ss:$12 sps:$4 sm:$0xff]   ;;  %v3849_v50 = vld [vmem:[%s5362_s6 + $0x55c] ss:$12 sps:$4 sm:$0xff]  }
 0x33d   :  { %2814 = vmatprep.mubr.bf16.mxu1 %v4782_v26  ;;  %2827 = vmatprep.subr.bf16.mxu0 %v3777_v23  ;;  %v3171_v59 = vmul.f32 -1.442695, %v4827_v1  ;;  %v3176_v36 = vmul.f32 -1.442695, %v4842_v35  ;;  %v3831_v24 = vld [vmem:[%s5362_s6 + $0x5a4] ss:$12 sps:$4 sm:$0xff]  }
 0x33e   :  { %2855 = vmatprep.mubr.bf16.mxu0 %v4788_v30 }
 0x33f   :  { %2787 = vmatpush1.bf16.msra.mxu1 %v3772_v27  ;;  %4072 = vpow2.f32 %v3171_v59 }
 0x340   :  { %2828 = vmatpush1.bf16.msra.mxu0 %v3775_v31  ;;  %2788 = vmatprep.subr.bf16.mxu1 %v3780_v32  ;;  %4074 = vpow2.f32 %v3173_v29  ;;  %v3829_v31 = vld [vmem:[%s5362_s6 + $0x5a0] ss:$12 sps:$4 sm:$0xff]  }
 0x341   :  { %2829 = vmatprep.subr.bf16.mxu0 %v3783_v38  ;;  %4076 = vpow2.f32 %v3176_v36  ;;  %v3834_v32 = vld [vmem:[%s5362_s6 + $0x40c] ss:$12 sps:$4 sm:$0xff]   ;;  %v3832_v38 = vld [vmem:[%s5362_s6 + $0x408] ss:$12 sps:$4 sm:$0xff]  }
 0x342   :  { %v3858_v36 = vld [vmem:[%s5362_s6 + $0x6ac] ss:$12 sps:$4 sm:$0xff]  }
 0x343   :  { %2789 = vmatpush1.bf16.msra.mxu1 %v3778_v40  ;;  %v3835_v40 = vld [vmem:[%s5362_s6 + $0x588] ss:$12 sps:$4 sm:$0xff]  }
 0x344   :  { %2830 = vmatpush1.bf16.msra.mxu0 %v3781_v42  ;;  %2790 = vmatprep.subr.bf16.mxu1 %v3786_v44  ;;  %v3843_v42 = vld [vmem:[%s5362_s6 + $0x574] ss:$12 sps:$4 sm:$0xff]   ;;  %v3838_v44 = vld [vmem:[%s5362_s6 + $0x3f0] ss:$12 sps:$4 sm:$0xff]  }
 0x345   :  { %2831 = vmatprep.subr.bf16.mxu0 %v3789_v48  ;;  %v3846_v48 = vld [vmem:[%s5362_s6 + $0x3dc] ss:$12 sps:$4 sm:$0xff]  }
 0x347   :  { %2791 = vmatpush1.bf16.msra.mxu1 %v3784_v51  ;;  %v3844_v51 = vld [vmem:[%s5362_s6 + $0x3d8] ss:$12 sps:$4 sm:$0xff]  }
 0x348   :  { %2832 = vmatpush1.bf16.msra.mxu0 %v3787_v54  ;;  %2792 = vmatprep.subr.bf16.mxu1 %v3792_v25  ;;  %v3847_v54 = vld [vmem:[%s5362_s6 + $0x558] ss:$12 sps:$4 sm:$0xff]  }
 0x349   :  { %2833 = vmatprep.subr.bf16.mxu0 %v3795_v56  ;;  %v3852_v25 = vld [vmem:[%s5362_s6 + $0x3c4] ss:$12 sps:$4 sm:$0xff]  }
 0x34b   :  { %2793 = vmatpush1.bf16.msra.mxu1 %v3790_v58  ;;  %v3855_v58 = vld [vmem:[%s5362_s6 + $0x544] ss:$12 sps:$4 sm:$0xff]  }
 0x34c   :  { %2834 = vmatpush1.bf16.msra.mxu0 %v3793_v37  ;;  %2794 = vmatprep.subr.bf16.mxu1 %v3798_v60  ;;  %v4073_v4 = vpop.eup %4072  ;;  %v3850_v60 = vld [vmem:[%s5362_s6 + $0x3c0] ss:$12 sps:$4 sm:$0xff]  }
 0x34d   :  { %2835 = vmatprep.subr.bf16.mxu0 %v3801_v61  ;;  %v4075_v17 = vpop.eup %4074  ;;  %v1037_v20 = vadd.f32 1.0, %v4073_v4  ;;  %v3853_v61 = vld [vmem:[%s5362_s6 + $0x540] ss:$12 sps:$4 sm:$0xff]   ;;  %v679_v4 = vrot.slane %v4816_v47, %v4714_v46  ;;  %v3876_v47 = vld [vmem:[%s5362_s6 + $0x648] ss:$12 sps:$4 sm:$0xff]  }
 0x34e   :  { %v4077_v18 = vpop.eup %4076  ;;  %v1039_v23 = vadd.f32 1.0, %v4075_v17  ;;  %v3878_v17 = vld [vmem:[%s5362_s6 + $0x64c] ss:$12 sps:$4 sm:$0xff]  }
 0x34f   :  { %2795 = vmatpush1.bf16.msra.mxu1 %v3796_v33  ;;  %v1042_v27 = vadd.f32 1.0, %v4077_v18  ;;  %4078 = vrcp.f32 %v1037_v20  ;;  %v3879_v18 = vld [vmem:[%s5362_s6 + $0x110] ss:$12 sps:$4 sm:$0xff]  }
 0x350   :  { %2836 = vmatpush1.bf16.msra.mxu0 %v3799_v63  ;;  %2796 = vmatprep.subr.bf16.mxu1 %v3804_v0  ;;  %4080 = vrcp.f32 %v1039_v23  ;;  %v3859_v63 = vld [vmem:[%s5362_s6 + $0x170] ss:$12 sps:$4 sm:$0xff]  }
 0x351   :  { %2837 = vmatprep.subr.bf16.mxu0 %v3807_v2  ;;  %4082 = vrcp.f32 %v1042_v27  ;;  %v3880_v20 = vld [vmem:[%s5362_s6 + $0x50] ss:$12 sps:$4 sm:$0xff]  }
 0x352   :  { %v3888_v27 = vld [vmem:[%s5362_s6 + $0x61c] ss:$12 sps:$4 sm:$0xff]  }
 0x353   :  { %2797 = vmatpush1.bf16.msra.mxu1 %v3802_v3 }
 0x354   :  { %2838 = vmatpush1.bf16.msra.mxu0 %v3805_v43  ;;  %2798 = vmatprep.subr.bf16.mxu1 %v3810_v39  ;;  %v3864_v39 = vld [vmem:[%s5362_s6 + $0x158] ss:$12 sps:$4 sm:$0xff]  }
 0x355   :  { %2839 = vmatprep.subr.bf16.mxu0 %v3813_v5  ;;  %v3861_v5 = vld [vmem:[%s5362_s6 + $0x690] ss:$12 sps:$4 sm:$0xff]  }
 0x357   :  { %2799 = vmatpush2.bf16.msra.mxu1 %v3808_v6  ;;  %v3865_v6 = vld [vmem:[%s5362_s6 + $0x98] ss:$12 sps:$4 sm:$0xff]  }
 0x358   :  { %2840 = vmatpush2.bf16.msra.mxu0 %v3811_v7  ;;  %2800 = vmatprep.subr.bf16.mxu1 %v3816_v8  ;;  %v3868_v7 = vld [vmem:[%s5362_s6 + $0x67c] ss:$12 sps:$4 sm:$0xff]   ;;  %v3869_v8 = vld [vmem:[%s5362_s6 + $0x140] ss:$12 sps:$4 sm:$0xff]  }
 0x359   :  { %2841 = vmatprep.subr.bf16.mxu0 %v3819_v12  ;;  %v3866_v12 = vld [vmem:[%s5362_s6 + $0x678] ss:$12 sps:$4 sm:$0xff]  }
 0x35b   :  { %2801 = vmatpush2.bf16.msra.mxu1 %v3814_v13  ;;  %v3870_v13 = vld [vmem:[%s5362_s6 + $0x80] ss:$12 sps:$4 sm:$0xff]  }
 0x35c   :  { %2842 = vmatpush2.bf16.msra.mxu0 %v3817_v57  ;;  %2802 = vmatprep.subr.bf16.mxu1 %v3822_v62  ;;  %v4079_v56 = vpop.eup %4078  ;;  %v3874_v57 = vld [vmem:[%s5362_s6 + $0x128] ss:$12 sps:$4 sm:$0xff]   ;;  %v3871_v62 = vld [vmem:[%s5362_s6 + $0x660] ss:$12 sps:$4 sm:$0xff]  }
 0x35d   :  { %2843 = vmatprep.subr.bf16.mxu0 %v3825_v14  ;;  %v4081_v59 = vpop.eup %4080  ;;  %v1067_v29 = vmul.f32 %v4079_v56, %v4827_v1  ;;  %v3856_v1 = vld [vmem:[%s5362_s6 + $0x6a8] ss:$12 sps:$4 sm:$0xff]  }
 0x35e   :  { %v4083_v37 = vpop.eup %4082  ;;  %v1069_v33 = vmul.f32 %v4081_v59, %v4836_v55  ;;  %v3860_v55 = vld [vmem:[%s5362_s6 + $0xb0] ss:$12 sps:$4 sm:$0xff]   ;;  %v3875_v14 = vld [vmem:[%s5362_s6 + $0x68] ss:$12 sps:$4 sm:$0xff]  }
 0x35f   :  { %2803 = vmatpush2.bf16.msra.mxu1 %v3820_v19  ;;  %v1072_v0 = vmul.f32 %v4083_v37, %v4842_v35  ;;  %v4985_v2 = vpack.c.bf16 %v1067_v29, %v1067_v29  ;;  %v3863_v35 = vld [vmem:[%s5362_s6 + $0x694] ss:$12 sps:$4 sm:$0xff]   ;;  %v5046_v19 = vadd.f32 %v4742_v53, %v679_v4  ;;  %v3881_v53 = vld [vmem:[%s5362_s6 + $0x630] ss:$12 sps:$4 sm:$0xff]  }
 0x360   :  { %2844 = vmatpush2.bf16.msra.mxu0 %v3823_v21  ;;  %2804 = vmatprep.subr.bf16.mxu1 %v3828_v22  ;;  %v4990_v3 = vpack.c.bf16 %v1069_v33, %v1069_v33  ;;  %v3883_v21 = vld [vmem:[%s5362_s6 + $0x634] ss:$12 sps:$4 sm:$0xff]   ;;  %v3884_v22 = vld [vmem:[%s5362_s6 + $0xf8] ss:$12 sps:$4 sm:$0xff]   ;;  %v3908_v56 = vld [vmem:[%s5362_s6 + $0x73c] ss:$12 sps:$4 sm:$0xff]  }
 0x361   :  { %2845 = vmatprep.subr.bf16.mxu0 %v3831_v24  ;;  %v4995_v43 = vpack.c.bf16 %v1072_v0, %v1072_v0  ;;  %v3175_v23 = vmul.f32 -1.442695, %v5046_v19  ;;  %v3885_v24 = vld [vmem:[%s5362_s6 + $0x38] ss:$12 sps:$4 sm:$0xff]   ;;  %v3910_v37 = vld [vmem:[%s5362_s6 + $0x200] ss:$12 sps:$4 sm:$0xff]  }
 0x362   :  { %v3914_v29 = vld [vmem:[%s5362_s6 + $0x2a8] ss:$12 sps:$4 sm:$0xff]   ;;  %v3918_v33 = vld [vmem:[%s5362_s6 + $0x70c] ss:$12 sps:$4 sm:$0xff]  }
 0x363   :  { %2805 = vmatpush2.bf16.msra.mxu1 %v3826_v28  ;;  %v3889_v28 = vld [vmem:[%s5362_s6 + $0xe0] ss:$12 sps:$4 sm:$0xff]   ;;  %4084 = vpow2.f32 %v3175_v23  ;;  %v3916_v0 = vld [vmem:[%s5362_s6 + $0x708] ss:$12 sps:$4 sm:$0xff]   ;;  %v3943_v23 = vld [vmem:[%s5362_s6 + $0x518] ss:$12 sps:$4 sm:$0xff]  }
 0x364   :  { %2846 = vmatpush2.bf16.msra.mxu0 %v3829_v31  ;;  %2806 = vmatprep.subr.bf16.mxu1 %v3834_v32  ;;  %v3886_v31 = vld [vmem:[%s5362_s6 + $0x618] ss:$12 sps:$4 sm:$0xff]   ;;  %v3890_v32 = vld [vmem:[%s5362_s6 + $0x20] ss:$12 sps:$4 sm:$0xff]  }
 0x365   :  { %2847 = vmatprep.subr.bf16.mxu0 %v3837_v34  ;;  %v3893_v34 = vld [vmem:[%s5362_s6 + $0x604] ss:$12 sps:$4 sm:$0xff]  }
 0x367   :  { %2807 = vmatpush2.bf16.msra.mxu1 %v3832_v38  ;;  %v3894_v38 = vld [vmem:[%s5362_s6 + $0xc8] ss:$12 sps:$4 sm:$0xff]  }
 0x368   :  { %2848 = vmatpush2.bf16.msra.mxu0 %v3835_v40  ;;  %2808 = vmatprep.subr.bf16.mxu1 %v3840_v41  ;;  %v3891_v40 = vld [vmem:[%s5362_s6 + $0x600] ss:$12 sps:$4 sm:$0xff]   ;;  %v3895_v41 = vld [vmem:[%s5362_s6 + $0x8] ss:$12 sps:$4 sm:$0xff]  }
 0x369   :  { %2849 = vmatprep.subr.bf16.mxu0 %v3843_v42  ;;  %v3898_v42 = vld [vmem:[%s5362_s6 + $0x76c] ss:$12 sps:$4 sm:$0xff]  }
 0x36b   :  { %2809 = vmatpush2.bf16.msra.mxu1 %v3838_v44  ;;  %v3899_v44 = vld [vmem:[%s5362_s6 + $0x2f0] ss:$12 sps:$4 sm:$0xff]  }
 0x36c   :  { %2850 = vmatpush2.bf16.msra.mxu0 %v3841_v45  ;;  %2810 = vmatprep.subr.bf16.mxu1 %v3846_v48  ;;  %v3896_v45 = vld [vmem:[%s5362_s6 + $0x768] ss:$12 sps:$4 sm:$0xff]   ;;  %v3900_v48 = vld [vmem:[%s5362_s6 + $0x230] ss:$12 sps:$4 sm:$0xff]  }
 0x36d   :  { %2851 = vmatprep.subr.bf16.mxu0 %v3849_v50  ;;  %v3903_v50 = vld [vmem:[%s5362_s6 + $0x754] ss:$12 sps:$4 sm:$0xff]  }
 0x36f   :  { %2811 = vmatpush2.bf16.msra.mxu1 %v3844_v51  ;;  %v3904_v51 = vld [vmem:[%s5362_s6 + $0x2d8] ss:$12 sps:$4 sm:$0xff]  }
 0x370   :  { %2852 = vmatpush2.bf16.msra.mxu0 %v3847_v54  ;;  %2812 = vmatprep.subr.bf16.mxu1 %v3852_v25  ;;  %v3901_v54 = vld [vmem:[%s5362_s6 + $0x750] ss:$12 sps:$4 sm:$0xff]   ;;  %v3905_v25 = vld [vmem:[%s5362_s6 + $0x218] ss:$12 sps:$4 sm:$0xff]  }
 0x371   :  { %2853 = vmatprep.subr.bf16.mxu0 %v3855_v58  ;;  %v4085_v58 = vpop.eup %4084 }
 0x372   :  { %v1041_v59 = vadd.f32 1.0, %v4085_v58  ;;  %v3965_v58 = vld [vmem:[%s5362_s6 + $0x548] ss:$12 sps:$4 sm:$0xff]  }
 0x373   :  { %2813 = vmatpush2.bf16.msra.mxu1 %v3850_v60  ;;  %v3913_v60 = vld [vmem:[%s5362_s6 + $0x724] ss:$12 sps:$4 sm:$0xff]  }
 0x374   :  { %2854 = vmatpush2.bf16.msra.mxu0 %v3853_v61  ;;  %2864 = vmatprep.subr.bf16.mxu1 %v3858_v36  ;;  %v3911_v61 = vld [vmem:[%s5362_s6 + $0x720] ss:$12 sps:$4 sm:$0xff]   ;;  %4086 = vrcp.f32 %v1041_v59  ;;  %v3915_v36 = vld [vmem:[%s5362_s6 + $0x1e8] ss:$12 sps:$4 sm:$0xff]   ;;  %v3968_v59 = vld [vmem:[%s5362_s6 + $0x770] ss:$12 sps:$4 sm:$0xff]  }
 0x375   :  { %3505 = vmatprep.subr.bf16.mxu0 %v3859_v63  ;;  %v3919_v63 = vld [vmem:[%s5362_s6 + $0x290] ss:$12 sps:$4 sm:$0xff]  }
 0x376   :  { %2815 = vmatmul.mubr.bf16.vlgmr.msra.gmra.mxu1 %v4985_v2 }
 0x377   :  { %2856 = vmatmul.mubr.bf16.vlgmr.msra.gmra.mxu0 %v4990_v3  ;;  %2865 = vmatpush1.bf16.msra.mxu1 %v3856_v1  ;;  %v3920_v1 = vld [vmem:[%s5362_s6 + $0x1d0] ss:$12 sps:$4 sm:$0xff]  }
 0x378   :  { %2896 = vmatprep.mubr.bf16.mxu1 %v4995_v43  ;;  %3506 = vmatpush3.bf16.msra.mxu0 %v3860_v55  ;;  %v3923_v55 = vld [vmem:[%s5362_s6 + $0x6f4] ss:$12 sps:$4 sm:$0xff]  }
 0x379   :  { %2937 = vmatprep.mubr.bf16.mxu0 %v4746_v15  ;;  %2866 = vmatprep.subr.bf16.mxu1 %v3863_v35  ;;  %v3873_v15 = vld [vmem:[%s5362_s6 + $0x664] ss:$12 sps:$4 sm:$0xff]  }
 0x37a   :  { %3507 = vmatprep.subr.bf16.mxu0 %v3864_v39  ;;  %v3924_v35 = vld [vmem:[%s5362_s6 + $0x278] ss:$12 sps:$4 sm:$0xff]   ;;  %v3921_v39 = vld [vmem:[%s5362_s6 + $0x6f0] ss:$12 sps:$4 sm:$0xff]  }
 0x37b   :  { %2867 = vmatpush1.bf16.msra.mxu1 %v3861_v5  ;;  %v3925_v5 = vld [vmem:[%s5362_s6 + $0x1b8] ss:$12 sps:$4 sm:$0xff]  }
 0x37c   :  { %3508 = vmatpush3.bf16.msra.mxu0 %v3865_v6  ;;  %2868 = vmatprep.subr.bf16.mxu1 %v3868_v7  ;;  %v3928_v6 = vld [vmem:[%s5362_s6 + $0x6dc] ss:$12 sps:$4 sm:$0xff]   ;;  %v3929_v7 = vld [vmem:[%s5362_s6 + $0x260] ss:$12 sps:$4 sm:$0xff]  }
 0x37d   :  { %3509 = vmatprep.subr.bf16.mxu0 %v3869_v8  ;;  %v3926_v8 = vld [vmem:[%s5362_s6 + $0x6d8] ss:$12 sps:$4 sm:$0xff]  }
 0x37f   :  { %2869 = vmatpush1.bf16.msra.mxu1 %v3866_v12  ;;  %v3930_v12 = vld [vmem:[%s5362_s6 + $0x1a0] ss:$12 sps:$4 sm:$0xff]  }
 0x380   :  { %3510 = vmatpush3.bf16.msra.mxu0 %v3870_v13  ;;  %2870 = vmatprep.subr.bf16.mxu1 %v3873_v15  ;;  %v3933_v13 = vld [vmem:[%s5362_s6 + $0x6c4] ss:$12 sps:$4 sm:$0xff]  }
 0x381   :  { %3511 = vmatprep.subr.bf16.mxu0 %v3874_v57  ;;  %v4087_v15 = vpop.eup %4086  ;;  %v3934_v57 = vld [vmem:[%s5362_s6 + $0x248] ss:$12 sps:$4 sm:$0xff]  }
 0x382   :  { %v1071_v4 = vmul.f32 %v4087_v15, %v5046_v19 }
 0x383   :  { %2871 = vmatpush1.bf16.msra.mxu1 %v3871_v62  ;;  %v3931_v62 = vld [vmem:[%s5362_s6 + $0x6c0] ss:$12 sps:$4 sm:$0xff]  }
 0x384   :  { %3512 = vmatpush3.bf16.msra.mxu0 %v3875_v14  ;;  %2872 = vmatprep.subr.bf16.mxu1 %v3878_v17  ;;  %v3935_v14 = vld [vmem:[%s5362_s6 + $0x188] ss:$12 sps:$4 sm:$0xff]   ;;  %v3936_v17 = vld [vmem:[%s5362_s6 + $0x470] ss:$12 sps:$4 sm:$0xff]   ;;  %v5196_v19 = vpack.c.bf16 %v1071_v4, %v1071_v4 }
 0x385   :  { %3513 = vmatprep.subr.bf16.mxu0 %v3879_v18  ;;  %v3937_v18 = vld [vmem:[%s5362_s6 + $0x5f0] ss:$12 sps:$4 sm:$0xff]  }
 0x387   :  { %2873 = vmatpush1.bf16.msra.mxu1 %v3876_v47  ;;  %v3938_v47 = vld [vmem:[%s5362_s6 + $0x3b0] ss:$12 sps:$4 sm:$0xff]  }
 0x388   :  { %3514 = vmatpush3.bf16.msra.mxu0 %v3880_v20  ;;  %2874 = vmatprep.subr.bf16.mxu1 %v3883_v21  ;;  %v3939_v20 = vld [vmem:[%s5362_s6 + $0x530] ss:$12 sps:$4 sm:$0xff]   ;;  %v3940_v21 = vld [vmem:[%s5362_s6 + $0x458] ss:$12 sps:$4 sm:$0xff]  }
 0x389   :  { %3515 = vmatprep.subr.bf16.mxu0 %v3884_v22  ;;  %v3941_v22 = vld [vmem:[%s5362_s6 + $0x5d8] ss:$12 sps:$4 sm:$0xff]  }
 0x38b   :  { %2875 = vmatpush1.bf16.msra.mxu1 %v3881_v53  ;;  %v3942_v53 = vld [vmem:[%s5362_s6 + $0x398] ss:$12 sps:$4 sm:$0xff]  }
 0x38c   :  { %3516 = vmatpush3.bf16.msra.mxu0 %v3885_v24  ;;  %2876 = vmatprep.subr.bf16.mxu1 %v3888_v27  ;;  %v3944_v24 = vld [vmem:[%s5362_s6 + $0x440] ss:$12 sps:$4 sm:$0xff]  }
 0x38d   :  { %3517 = vmatprep.subr.bf16.mxu0 %v3889_v28  ;;  %v3947_v27 = vld [vmem:[%s5362_s6 + $0x500] ss:$12 sps:$4 sm:$0xff]   ;;  %v3949_v28 = vld [vmem:[%s5362_s6 + $0x5a8] ss:$12 sps:$4 sm:$0xff]  }
 0x38f   :  { %2877 = vmatpush1.bf16.msra.mxu1 %v3886_v31  ;;  %v3950_v31 = vld [vmem:[%s5362_s6 + $0x368] ss:$12 sps:$4 sm:$0xff]  }
 0x390   :  { %3518 = vmatpush3.bf16.msra.mxu0 %v3890_v32  ;;  %2878 = vmatprep.subr.bf16.mxu1 %v3893_v34  ;;  %v3951_v32 = vld [vmem:[%s5362_s6 + $0x4e8] ss:$12 sps:$4 sm:$0xff]   ;;  %v3952_v34 = vld [vmem:[%s5362_s6 + $0x410] ss:$12 sps:$4 sm:$0xff]  }
 0x391   :  { %3519 = vmatprep.subr.bf16.mxu0 %v3894_v38  ;;  %v3953_v38 = vld [vmem:[%s5362_s6 + $0x590] ss:$12 sps:$4 sm:$0xff]  }
 0x393   :  { %2879 = vmatpush1.bf16.msra.mxu1 %v3891_v40  ;;  %v3954_v40 = vld [vmem:[%s5362_s6 + $0x350] ss:$12 sps:$4 sm:$0xff]  }
 0x394   :  { %3520 = vmatpush3.bf16.msra.mxu0 %v3895_v41  ;;  %2880 = vmatprep.subr.bf16.mxu1 %v3898_v42  ;;  %v3955_v41 = vld [vmem:[%s5362_s6 + $0x4d0] ss:$12 sps:$4 sm:$0xff]   ;;  %v3956_v42 = vld [vmem:[%s5362_s6 + $0x3f8] ss:$12 sps:$4 sm:$0xff]  }
 0x395   :  { %3527 = vmatprep.subr.bf16.mxu0 %v3899_v44  ;;  %v3957_v44 = vld [vmem:[%s5362_s6 + $0x578] ss:$12 sps:$4 sm:$0xff]  }
 0x397   :  { %2938 = vmatmul.mubr.bf16.vlgmr.msra.gmra.mxu0 %v4751_v52  ;;  %2881 = vmatpush2.bf16.msra.mxu1 %v3896_v45  ;;  %v3909_v52 = vld [vmem:[%s5362_s6 + $0x2c0] ss:$12 sps:$4 sm:$0xff]   ;;  %v3958_v45 = vld [vmem:[%s5362_s6 + $0x338] ss:$12 sps:$4 sm:$0xff]  }
 0x398   :  { %3528 = vmatpush3.bf16.msra.mxu0 %v3900_v48  ;;  %2977 = vmatprep.mubr.bf16.mxu0 %v4753_v16  ;;  %v3906_v16 = vld [vmem:[%s5362_s6 + $0x738] ss:$12 sps:$4 sm:$0xff]  }
 0x399   :  { %2882 = vmatprep.subr.bf16.mxu1 %v3903_v50  ;;  %3529 = vmatprep.subr.bf16.mxu0 %v3904_v51  ;;  %v3959_v48 = vld [vmem:[%s5362_s6 + $0x4b8] ss:$12 sps:$4 sm:$0xff]   ;;  %v3960_v50 = vld [vmem:[%s5362_s6 + $0x3e0] ss:$12 sps:$4 sm:$0xff]  }
 0x39a   :  { %v3961_v51 = vld [vmem:[%s5362_s6 + $0x560] ss:$12 sps:$4 sm:$0xff]  }
 0x39b   :  { %2883 = vmatpush2.bf16.msra.mxu1 %v3901_v54  ;;  %v3962_v54 = vld [vmem:[%s5362_s6 + $0x320] ss:$12 sps:$4 sm:$0xff]  }
 0x39c   :  { %3530 = vmatpush3.bf16.msra.mxu0 %v3905_v25  ;;  %2884 = vmatprep.subr.bf16.mxu1 %v3908_v56  ;;  %v3963_v25 = vld [vmem:[%s5362_s6 + $0x4a0] ss:$12 sps:$4 sm:$0xff]   ;;  %v3964_v56 = vld [vmem:[%s5362_s6 + $0x3c8] ss:$12 sps:$4 sm:$0xff]  }
 0x39d   :  { %3531 = vmatprep.subr.bf16.mxu0 %v3909_v52  ;;  %v3966_v52 = vld [vmem:[%s5362_s6 + $0x308] ss:$12 sps:$4 sm:$0xff]  }
 0x39f   :  { %2885 = vmatpush2.bf16.msra.mxu1 %v3906_v16  ;;  %v3967_v16 = vld [vmem:[%s5362_s6 + $0x488] ss:$12 sps:$4 sm:$0xff]  }
 0x3a0   :  { %3532 = vmatpush3.bf16.msra.mxu0 %v3910_v37  ;;  %2886 = vmatprep.subr.bf16.mxu1 %v3913_v60  ;;  %v3969_v37 = vld [vmem:[%s5362_s6 + $0x6b0] ss:$12 sps:$4 sm:$0xff]   ;;  %v3970_v60 = vld [vmem:[%s5362_s6 + $0x758] ss:$12 sps:$4 sm:$0xff]  }
 0x3a1   :  { %3533 = vmatprep.subr.bf16.mxu0 %v3914_v29  ;;  %v3971_v29 = vld [vmem:[%s5362_s6 + $0x698] ss:$12 sps:$4 sm:$0xff]  }
 0x3a3   :  { %2887 = vmatpush2.bf16.msra.mxu1 %v3911_v61  ;;  %v3972_v61 = vld [vmem:[%s5362_s6 + $0x740] ss:$12 sps:$4 sm:$0xff]  }
 0x3a4   :  { %3534 = vmatpush3.bf16.msra.mxu0 %v3915_v36  ;;  %2888 = vmatprep.subr.bf16.mxu1 %v3918_v33  ;;  %v3973_v36 = vld [vmem:[%s5362_s6 + $0x680] ss:$12 sps:$4 sm:$0xff]   ;;  %v3977_v33 = vld [vmem:[%s5362_s6 + $0x650] ss:$12 sps:$4 sm:$0xff]  }
 0x3a5   :  { %3535 = vmatprep.subr.bf16.mxu0 %v3919_v63  ;;  %v3978_v63 = vld [vmem:[%s5362_s6 + $0x6f8] ss:$12 sps:$4 sm:$0xff]  }
 0x3a7   :  { %2889 = vmatpush2.bf16.msra.mxu1 %v3916_v0  ;;  %v3979_v0 = vld [vmem:[%s5362_s6 + $0x638] ss:$12 sps:$4 sm:$0xff]  }
 0x3a8   :  { %3536 = vmatpush3.bf16.msra.mxu0 %v3920_v1  ;;  %2890 = vmatprep.subr.bf16.mxu1 %v3923_v55  ;;  %v3980_v1 = vld [vmem:[%s5362_s6 + $0x6e0] ss:$12 sps:$4 sm:$0xff]  }
 0x3a9   :  { %3537 = vmatprep.subr.bf16.mxu0 %v3924_v35  ;;  %v3981_v55 = vld [vmem:[%s5362_s6 + $0x620] ss:$12 sps:$4 sm:$0xff]   ;;  %v3982_v35 = vld [vmem:[%s5362_s6 + $0x6c8] ss:$12 sps:$4 sm:$0xff]  }
 0x3ab   :  { %2891 = vmatpush2.bf16.msra.mxu1 %v3921_v39  ;;  %v3983_v39 = vld [vmem:[%s5362_s6 + $0x608] ss:$12 sps:$4 sm:$0xff]  }
 0x3ac   :  { %3538 = vmatpush3.bf16.msra.mxu0 %v3925_v5  ;;  %2892 = vmatprep.subr.bf16.mxu1 %v3928_v6  ;;  %v1403_v5 = vld [vmem:[%s5364_s7] sm:$0x7] }
 0x3ad   :  { %3539 = vmatprep.subr.bf16.mxu0 %v3929_v7  ;;  %v1408_v6 = vrot.slane %v1403_v5, %v4714_v46  ;;  %v1412_v7 = vrot.slane %v1403_v5, %v4723_v11 }
 0x3af   :  { %2893 = vmatpush2.bf16.msra.mxu1 %v3926_v8 }
 0x3b0   :  { %3540 = vmatpush3.bf16.msra.mxu0 %v3930_v12  ;;  %2894 = vmatprep.subr.bf16.mxu1 %v3933_v13 }
 0x3b1   :  { %3541 = vmatprep.subr.bf16.mxu0 %v3934_v57 }
 0x3b3   :  { %2895 = vmatpush2.bf16.msra.mxu1 %v3931_v62 }
 0x3b4   :  { %3542 = vmatpush3.bf16.msra.mxu0 %v3935_v14  ;;  %3549 = vmatprep.subr.bf16.mxu1 %v3936_v17 }
 0x3b5   :  { %3571 = vmatprep.subr.bf16.mxu0 %v3937_v18 }
 0x3b6   :  { %2897 = vmatmul.mubr.bf16.vlgmr.msra.gmra.mxu1 %v5196_v19 }
 0x3b7   :  { %2978 = vmatmul.mubr.bf16.vlgmr.msra.gmra.mxu0 %v4761_v9  ;;  %3550 = vmatpush3.bf16.msra.mxu1 %v3938_v47  ;;  %v3945_v9 = vld [vmem:[%s5362_s6 + $0x5c0] ss:$12 sps:$4 sm:$0xff]  }
 0x3b8   :  { %3017 = vmatprep.mubr.bf16.mxu1 %v4782_v26  ;;  %3572 = vmatpush3.bf16.msra.mxu0 %v3939_v20  ;;  %v3946_v26 = vld [vmem:[%s5362_s6 + $0x380] ss:$12 sps:$4 sm:$0xff]  }
 0x3b9   :  { %3057 = vmatprep.mubr.bf16.mxu0 %v4788_v30  ;;  %3551 = vmatprep.subr.bf16.mxu1 %v3940_v21  ;;  %v3948_v30 = vld [vmem:[%s5362_s6 + $0x428] ss:$12 sps:$4 sm:$0xff]  }
 0x3ba   :  { %3573 = vmatprep.subr.bf16.mxu0 %v3941_v22 }
 0x3bb   :  { %3552 = vmatpush3.bf16.msra.mxu1 %v3942_v53 }
 0x3bc   :  { %3574 = vmatpush3.bf16.msra.mxu0 %v3943_v23  ;;  %3553 = vmatprep.subr.bf16.mxu1 %v3944_v24 }
 0x3bd   :  { %3575 = vmatprep.subr.bf16.mxu0 %v3945_v9 }
 0x3bf   :  { %3554 = vmatpush3.bf16.msra.mxu1 %v3946_v26 }
 0x3c0   :  { %3576 = vmatpush3.bf16.msra.mxu0 %v3947_v27  ;;  %3555 = vmatprep.subr.bf16.mxu1 %v3948_v30 }
 0x3c1   :  { %3577 = vmatprep.subr.bf16.mxu0 %v3949_v28 }
 0x3c3   :  { %3556 = vmatpush3.bf16.msra.mxu1 %v3950_v31 }
 0x3c4   :  { %3578 = vmatpush3.bf16.msra.mxu0 %v3951_v32  ;;  %3557 = vmatprep.subr.bf16.mxu1 %v3952_v34 }
 0x3c5   :  { %3579 = vmatprep.subr.bf16.mxu0 %v3953_v38 }
 0x3c7   :  { %3558 = vmatpush3.bf16.msra.mxu1 %v3954_v40 }
 0x3c8   :  { %3580 = vmatpush3.bf16.msra.mxu0 %v3955_v41  ;;  %3559 = vmatprep.subr.bf16.mxu1 %v3956_v42 }
 0x3c9   :  { %3581 = vmatprep.subr.bf16.mxu0 %v3957_v44 }
 0x3cb   :  { %3560 = vmatpush3.bf16.msra.mxu1 %v3958_v45 }
 0x3cc   :  { %3582 = vmatpush3.bf16.msra.mxu0 %v3959_v48  ;;  %3561 = vmatprep.subr.bf16.mxu1 %v3960_v50 }
 0x3cd   :  { %3583 = vmatprep.subr.bf16.mxu0 %v3961_v51 }
 0x3cf   :  { %3562 = vmatpush3.bf16.msra.mxu1 %v3962_v54 }
 0x3d0   :  { %3584 = vmatpush3.bf16.msra.mxu0 %v3963_v25  ;;  %3563 = vmatprep.subr.bf16.mxu1 %v3964_v56 }
 0x3d1   :  { %3585 = vmatprep.subr.bf16.mxu0 %v3965_v58 }
 0x3d3   :  { %3564 = vmatpush3.bf16.msra.mxu1 %v3966_v52 }
 0x3d4   :  { %3586 = vmatpush3.bf16.msra.mxu0 %v3967_v16  ;;  %3593 = vmatprep.subr.bf16.mxu1 %v3968_v59 }
 0x3d6   :  { %3018 = vmatmul.mubr.bf16.vlgmr.msra.gmra.mxu1 %v4985_v2  ;;  %v3974_v2 = vld [vmem:[%s5362_s6 + $0x728] ss:$12 sps:$4 sm:$0xff]  }
 0x3d7   :  { %3058 = vmatmul.mubr.bf16.vlgmr.msra.gmra.mxu0 %v4990_v3  ;;  %3594 = vmatpush3.bf16.msra.mxu1 %v3969_v37  ;;  %v3975_v3 = vld [vmem:[%s5362_s6 + $0x668] ss:$12 sps:$4 sm:$0xff]  }
 0x3d8   :  { %3097 = vmatprep.mubr.bf16.mxu1 %v4995_v43  ;;  %3595 = vmatprep.subr.bf16.mxu1 %v3970_v60  ;;  %v3976_v43 = vld [vmem:[%s5362_s6 + $0x710] ss:$12 sps:$4 sm:$0xff]  }
 0x3db   :  { %3596 = vmatpush3.bf16.msra.mxu1 %v3971_v29 }
 0x3dc   :  { %3597 = vmatprep.subr.bf16.mxu1 %v3972_v61  ;;  %v1416_v61 = vrot.slane %v1403_v5, %v654_v10 }
 0x3df   :  { %3598 = vmatpush3.bf16.msra.mxu1 %v3973_v36 }
 0x3e0   :  { %3599 = vmatprep.subr.bf16.mxu1 %v3974_v2 }
 0x3e3   :  { %3600 = vmatpush3.bf16.msra.mxu1 %v3975_v3 }
 0x3e4   :  { %3601 = vmatprep.subr.bf16.mxu1 %v3976_v43 }
 0x3e7   :  { %3602 = vmatpush3.bf16.msra.mxu1 %v3977_v33 }
 0x3e8   :  { %3603 = vmatprep.subr.bf16.mxu1 %v3978_v63 }
 0x3eb   :  { %3604 = vmatpush3.bf16.msra.mxu1 %v3979_v0 }
 0x3ec   :  { %3605 = vmatprep.subr.bf16.mxu1 %v3980_v1 }
 0x3ef   :  { %3606 = vmatpush3.bf16.msra.mxu1 %v3981_v55 }
 0x3f0   :  { %3607 = vmatprep.subr.bf16.mxu1 %v3982_v35 }
 0x3f3   :  { %3608 = vmatpush3.bf16.msra.mxu1 %v3983_v39 }
 0x3f6   :  { %3098 = vmatmul.mubr.bf16.vlgmr.msra.gmra.mxu1 %v5196_v19  ;;  %v2734_v8 = vpop.f32.mrf.mxu1 }
 0x3f7   :  { %v2735_v12 = vadd.f32 %v2734_v8, %v1408_v6  ;;  %v2775_v13 = vpop.f32.mrf.mxu0 }
 0x3f8   :  { %v2736_v15 = vpop.f32.mrf.mxu1 }
 0x3f9   :  { %v2776_v57 = vadd.f32 %v2775_v13, %v2735_v12  ;;  %v2737_v62 = vadd.f32 %v2736_v15, %v1412_v7  ;;  %v2777_v4 = vpop.f32.mrf.mxu0 }
 0x3fa   :  { %v2738_v14 = vpop.f32.mrf.mxu1 }
 0x3fb   :  { %v2778_v17 = vadd.f32 %v2777_v4, %v2737_v62  ;;  %v2779_v18 = vpop.f32.mrf.mxu0 }
 0x3fc   :  { %v2739_v47 = vpop.f32.mrf.mxu1 }
 0x3fd   :  { %v2780_v20 = vpop.f32.mrf.mxu0 }
 0x436   :  { %v2816_v21 = vpop.f32.mrf.mxu1 }
 0x437   :  { %v2857_v22 = vpop.f32.mrf.mxu0  ;;  %v2817_v31 = vadd.f32 %v2816_v21, %v2776_v57 }
 0x438   :  { %v2818_v53 = vpop.f32.mrf.mxu1 }
 0x439   :  { %v2859_v46 = vpop.f32.mrf.mxu0  ;;  %v2819_v32 = vadd.f32 %v2818_v53, %v2778_v17  ;;  %v2858_v34 = vadd.f32 %v2857_v22, %v2817_v31 }
 0x43a   :  { %v2820_v23 = vpop.f32.mrf.mxu1 }
 0x43b   :  { %v2861_v11 = vpop.f32.mrf.mxu0  ;;  %v2860_v40 = vadd.f32 %v2859_v46, %v2819_v32 }
 0x43c   :  { %v2821_v24 = vpop.f32.mrf.mxu1 }
 0x43d   :  { %v2862_v19 = vpop.f32.mrf.mxu0 }
 0x457   :  { %v3521_v9 = vpop.f32.mrf.mxu0 }
 0x459   :  { %v3522_v26 = vpop.f32.mrf.mxu0 }
 0x45a   :  { %v3523_v27 = vadd.f32 %v3522_v26, %v3521_v9 }
 0x45b   :  { %v3524_v30 = vpop.f32.mrf.mxu0 }
 0x45c   :  { %v2940_v2 = vadd.f32 %v3523_v27, %v1416_v61 }
 0x45d   :  { %v3525_v28 = vpop.f32.mrf.mxu0 }
 0x476   :  { %v2898_v38 = vpop.f32.mrf.mxu1 }
 0x477   :  { %v2899_v41 = vadd.f32 %v2898_v38, %v2858_v34  ;;  %v3543_v42 = vpop.f32.mrf.mxu0 }
 0x478   :  { %v2900_v44 = vpop.f32.mrf.mxu1 }
 0x479   :  { %3105 = vst [vmem:[%s5365_s8] sm:$0xff] %v2899_v41  ;;  %v2901_v45 = vadd.f32 %v2900_v44, %v2860_v40  ;;  %v3544_v48 = vpop.f32.mrf.mxu0 }
 0x47a   :  { %v2902_v50 = vpop.f32.mrf.mxu1  ;;  %v3545_v36 = vadd.f32 %v3544_v48, %v3543_v42 }
 0x47b   :  { %3106 = vst [vmem:[%s5365_s8 + $0x8] sm:$0xff] %v2901_v45  ;;  %v3546_v51 = vpop.f32.mrf.mxu0 }
 0x47c   :  { %v2903_v54 = vpop.f32.mrf.mxu1  ;;  %v2980_v43 = vadd.f32 %v3545_v36, %v2940_v2 }
 0x47d   :  { %v3547_v25 = vpop.f32.mrf.mxu0 }
 0x496   :  { %v3565_v56 = vpop.f32.mrf.mxu1 }
 0x497   :  { %v3587_v58 = vpop.f32.mrf.mxu0 }
 0x498   :  { %v3566_v52 = vpop.f32.mrf.mxu1 }
 0x499   :  { %v3588_v16 = vpop.f32.mrf.mxu0  ;;  %v3567_v3 = vadd.f32 %v3566_v52, %v3565_v56 }
 0x49a   :  { %v3568_v59 = vpop.f32.mrf.mxu1  ;;  %v3589_v0 = vadd.f32 %v3588_v16, %v3587_v58 }
 0x49b   :  { %v3590_v37 = vpop.f32.mrf.mxu0  ;;  %v3020_v33 = vadd.f32 %v3567_v3, %v2980_v43 }
 0x49c   :  { %v3569_v60 = vpop.f32.mrf.mxu1 }
 0x49d   :  { %v3591_v29 = vpop.f32.mrf.mxu0  ;;  %v3060_v55 = vadd.f32 %v3589_v0, %v3020_v33 }
 0x4b6   :  { %v3609_v63 = vpop.f32.mrf.mxu1 }
 0x4b8   :  { %v3610_v1 = vpop.f32.mrf.mxu1 }
 0x4b9   :  { %v3611_v35 = vadd.f32 %v3610_v1, %v3609_v63 }
 0x4ba   :  { %v3612_v39 = vpop.f32.mrf.mxu1 }
 0x4bb   :  { %v3100_v6 = vadd.f32 %v3611_v35, %v3060_v55 }
 0x4bc   :  { %v3613_v7 = vpop.f32.mrf.mxu1 }
 0x4bd   :  { %3107 = vst [vmem:[%s5365_s8 + $0x10] sm:$0xff] %v3100_v6 }

</bundles_post_ra>
